<compile_context>
chip_gen: v6e
topology: v6e:2x2x1
jax: 0.10.0
libtpu: 0.0.40
codegen_flags: <defaults>
</compile_context>

<pallas_src>
import functools
import math

import jax
import jax.numpy as jnp
import numpy as np
from jax import lax
from jax.experimental import pallas as pl
from jax.experimental.pallas import tpu as pltpu


CIN = 12      # conv1 input channels
CMID = 24     # conv1 out == conv2 in == conv2 out channels
CPAD = 32     # CMID padded to a bf16 sublane-tile multiple -> aligned tap stores
K1 = 4        # conv1 kernel == stride (non-overlapping patchify)
K2 = 5        # conv2 kernel, padding=2 ("same")

_INV_SQRT2 = 0.7071067811865476


def _gelu_minus_x(v):
    """gelu(v) - v == 0.5*v*(erf(v/sqrt(2)) - 1), computed cancellation-free.

    erf(z)-1 is evaluated through erfc(|z|) with the Abramowitz-Stegun 7.1.26
    polynomial (|err| < 1.5e-7): for z >= 0 it is exactly -erfc(|z|), for
    z < 0 it is erfc(|z|) - 2.  exp() rides the EUP; one select total.
    """
    z = v * _INV_SQRT2
    az = jnp.abs(z)
    t = 1.0 / (1.0 + 0.3275911 * az)
    poly = ((((1.061405429 * t - 1.453152027) * t + 1.421413741) * t
             - 0.284496736) * t + 0.254829592) * t
    erfc_az = poly * jnp.exp(-az * az)                        # erfc(|z|)
    erf_m1 = jnp.where(z >= 0.0, -erfc_az, erfc_az - 2.0)     # erf(z) - 1
    return 0.5 * v * erf_m1


def _build_tap_masks(n, ho, wo):
    """(K2*K2, n*ho*wo) f32 0/1 masks for the "same"-padding lane-roll taps.

    Pure function of static shapes -> computed with numpy at trace time and
    passed to the kernel as a tiny constant VMEM input (~12.5 KiB).
    """
    m = n * ho * wo
    lane = np.arange(m)
    row = (lane % (ho * wo)) // wo
    col = lane % wo
    rows = []
    for kh in range(K2):
        for kw in range(K2):
            dh, dw = kh - K2 // 2, kw - K2 // 2
            valid = ((row + dh >= 0) & (row + dh < ho)
                     & (col + dw >= 0) & (col + dw < wo))
            rows.append(valid.astype(np.float32))
    return np.stack(rows, axis=0)


def _fused_kernel(p1t_ref, w1_ref, b1_ref, w2_ref, b2_ref, mask_ref,
                  out_ref, patches_ref, *, n, ho, wo):
    """Whole forward pass in one kernel, everything resident in VMEM.

    Layout is "transposed": channels on sublanes, M = n*ho*wo on lanes, so the
    conv2 im2col shifts are pure lane-rolls and the matmul outputs are
    lane-dense (24, M).  Output is stored per-image so HBM order is NCHW.
    """
    m = n * ho * wo
    hw = ho * wo

    # ---- conv1: one bf16 MXU matmul (output channels padded to CPAD) -------
    # p1t: (CIN*K1*K1, M) rows ordered (cin, kh, kw); w1: (CPAD, CIN*K1*K1).
    v1p = jnp.dot(w1_ref[...], p1t_ref[...],
                  preferred_element_type=jnp.float32) + b1_ref[...]   # (CPAD, M)
    v1 = v1p[:CMID, :]                                                # real chans

    # ---- conv2 im2col: 25 lane-roll taps streamed into bf16 VMEM scratch ----
    # Lane index encodes (img, row, col); a spatial shift (dh, dw) inside one
    # image is a lane shift of dh*wo + dw.  Out-of-image positions are zeroed
    # with the precomputed constant masks (cross-image lane wrap only occurs
    # on masked-out positions).  Each tap is a CPAD-row slab -> aligned store.
    t = 0
    for kh in range(K2):
        for kw in range(K2):
            dh, dw = kh - K2 // 2, kw - K2 // 2
            if dh == 0 and dw == 0:
                tap = v1p                                     # center: always valid
            else:
                s = dh * wo + dw                              # source lane offset
                tap = (pltpu.roll(v1p, (-s) % m, axis=1)      # lane rotate (XLU)
                       * mask_ref[pl.ds(t, 1), :])            # (1, M) 0/1 mask
            patches_ref[pl.ds(t * CPAD, CPAD), :] = tap.astype(jnp.bfloat16)
            t += 1

    # ---- conv2: ONE bf16 K = 25*CPAD MXU matmul, f32 accumulate -------------
    v2 = jnp.dot(w2_ref[...], patches_ref[...],
                 preferred_element_type=jnp.float32) + b2_ref[...]    # (CMID, M)

    # ---- fused elementwise tail ---------------------------------------------
    v4 = v2 - (v1 - 0.5)              # v4 = v2 - (v1 - 0.5)
    v6 = _gelu_minus_x(v4)            # v6 = gelu(v4) - v4 ; (CMID, M) f32

    # Store per image: out is (N, CMID, Ho*Wo) == NCHW-linear element order,
    # so the wrapper reshape to (N, CMID, Ho, Wo) is pure metadata.
    for i in range(n):
        out_ref[i] = v6[:, i * hw:(i + 1) * hw]


def model_forward(x, w1, b1, w2, b2):
    """x: (N, 12, 32, 32) f32 NCHW -> (N, 24, 8, 8) f32 NCHW."""
    N, C, H, W = x.shape
    HO, WO = H // K1, W // K1
    HW = HO * WO
    M = N * HW

    # conv1 patchify in transposed (K, M) layout + bf16 cast -- one small XLA
    # copy; it fuses with the surrounding graph when embedded in a larger jit.
    # Rows ordered (cin, kh, kw); columns ordered (n, ho, wo).
    # TODO(synk): fold this patchify into the kernel (ANY-space x + strided
    # loads) if an xprof trace shows it as a standalone launch.
    p1t = (x.reshape(N, C, HO, K1, WO, K1)
             .transpose(1, 3, 5, 0, 2, 4)
             .reshape(C * K1 * K1, M)).astype(jnp.bfloat16)           # (192, M)

    # conv1 weights/bias padded to CPAD output channels (zeros) so every
    # im2col tap is a bf16-tile-aligned 32-row slab in the scratch.
    w1p = jnp.pad(w1.reshape(CMID, C * K1 * K1),
                  ((0, CPAD - CMID), (0, 0))).astype(jnp.bfloat16)    # (32, 192)
    b1p = jnp.pad(b1, (0, CPAD - CMID)).reshape(CPAD, 1)              # (32, 1) f32

    # conv2 weights: columns ordered (kh, kw, cin_padded) to match the scratch.
    w2p = jnp.pad(jnp.transpose(w2, (0, 2, 3, 1)),
                  ((0, 0), (0, 0), (0, 0), (0, CPAD - CMID)))
    w2p = w2p.reshape(CMID, K2 * K2 * CPAD).astype(jnp.bfloat16)      # (24, 800)

    # 25 boundary masks: compile-time constant, tiny VMEM input.
    mask = jnp.asarray(_build_tap_masks(N, HO, WO))                   # (25, M) f32

    kernel = functools.partial(_fused_kernel, n=N, ho=HO, wo=WO)
    vmem = pl.BlockSpec(memory_space=pltpu.MemorySpace.VMEM)

    flops = 2 * CPAD * (C * K1 * K1) * M + 2 * CMID * (K2 * K2 * CPAD) * M
    bytes_accessed = (p1t.size * 2 + w1p.size * 2 + w2p.size * 2
                      + mask.size * 4 + b1p.size * 4 + CMID * 4
                      + N * CMID * HW * 4)

    # Single fused, grid-less kernel: total working set < 1 MB so it all sits
    # in VMEM on one TensorCore; no vmem_limit tuning needed on any generation.
    # (If the batch ever grows, add a grid over images with
    # dimension_semantics=("parallel",) so v7x's two TensorCores split the
    # work; at M=128 the per-step grid overhead would lose.)
    out = pl.pallas_call(
        kernel,
        out_shape=jax.ShapeDtypeStruct((N, CMID, HW), jnp.float32),
        in_specs=[vmem] * 6,
        out_specs=vmem,
        scratch_shapes=[pltpu.VMEM((K2 * K2 * CPAD, M), jnp.bfloat16)],
        cost_estimate=pl.CostEstimate(flops=flops,
                                      transcendentals=2 * CMID * M,
                                      bytes_accessed=bytes_accessed),
    )(p1t, w1p, b1p, w2p, b2.reshape(CMID, 1), mask)

    # (N, CMID, Ho*Wo) is already NCHW-linear: pure metadata reshape.
    return out.reshape(N, CMID, HO, WO)


def _reference_forward(x, w1, b1, w2, b2):
    """Plain-XLA reference of the (corrected) module for the self-check."""
    dn = ("NCHW", "OIHW", "NCHW")
    v1 = lax.conv_general_dilated(
        x, w1, window_strides=(K1, K1), padding="VALID",
        dimension_numbers=dn, precision=lax.Precision.HIGHEST)
    v1 = v1 + b1.reshape(1, -1, 1, 1)
    v2 = lax.conv_general_dilated(
        v1, w2, window_strides=(1, 1), padding=((2, 2), (2, 2)),
        dimension_numbers=dn, precision=lax.Precision.HIGHEST)
    v2 = v2 + b2.reshape(1, -1, 1, 1)
    v4 = v2 - (v1 - 0.5)
    return jax.nn.gelu(v4, approximate=False) - v4


if __name__ == "__main__":
    key = jax.random.PRNGKey(0)
    k1, k2, k3, kx = jax.random.split(key, 4)

    # Deterministic PyTorch-style (kaiming-uniform-ish) init.
    fan1 = CIN * K1 * K1
    lim1 = 1.0 / math.sqrt(fan1)
    w1 = jax.random.uniform(k1, (CMID, CIN, K1, K1), jnp.float32, -lim1, lim1)
    b1 = jax.random.uniform(k2, (CMID,), jnp.float32, -lim1, lim1)

    fan2 = CMID * K2 * K2
    lim2 = 1.0 / math.sqrt(fan2)
    w2 = jax.random.uniform(k3, (CMID, CMID, K2, K2), jnp.float32, -lim2, lim2)
    b2 = b1  # mirrors `self.conv2.bias.data = self.conv1.bias.data`

    x1 = jax.random.normal(kx, (2, CIN, 32, 32), jnp.float32)

    out = jax.jit(model_forward)(x1, w1, b1, w2, b2)
    out = jax.block_until_ready(out)
    assert out.shape == (2, CMID, 32 // K1, 32 // K1)
    assert bool(jnp.all(jnp.isfinite(out)))

    # Numerical self-check against a plain-XLA reference of the same
    # (corrected) forward.  Tolerance accounts for bf16 MXU operands with f32
    # accumulation (observed error ~1e-2 worst case at these shapes).
    ref = _reference_forward(x1, w1, b1, w2, b2)
    err = float(jnp.max(jnp.abs(out - ref)))
    assert err < 5e-2, f"max |out - ref| = {err}"

    print("KERNEL_OK")
</pallas_src>

<mosaic_0001>
module attributes {stable_mosaic.version = 11 : i64} {
  func.func @_fused_kernel(%arg0: memref<192x128xbf16, #tpu.memory_space<vmem>>, %arg1: memref<32x192xbf16, #tpu.memory_space<vmem>>, %arg2: memref<32x1xf32, #tpu.memory_space<vmem>>, %arg3: memref<24x800xbf16, #tpu.memory_space<vmem>>, %arg4: memref<24x1xf32, #tpu.memory_space<vmem>>, %arg5: memref<25x128xf32, #tpu.memory_space<vmem>>, %arg6: memref<2x24x64xf32, #tpu.memory_space<vmem>>, %arg7: memref<800x128xbf16, #tpu.memory_space<vmem>>) attributes {dimension_semantics = [], scalar_prefetch = 0 : i64, scratch_operands = 1 : i64, tpu.core_type = #tpu.core_type<tc>} {
    %c0 = arith.constant 0 : index
    %c0_0 = arith.constant 0 : index
    %0 = vector.load %arg1[%c0, %c0_0] : memref<32x192xbf16, #tpu.memory_space<vmem>>, vector<32x192xbf16>
    %c0_1 = arith.constant 0 : index
    %c0_2 = arith.constant 0 : index
    %1 = vector.load %arg0[%c0_1, %c0_2] : memref<192x128xbf16, #tpu.memory_space<vmem>>, vector<192x128xbf16>
    %cst = arith.constant dense<0.000000e+00> : vector<32x128xf32>
    %2 = tpu.matmul %0, %1, %cst {dimension_numbers = #tpu.dot_dimension_numbers<[1], [0], [0], [1], [0, 0, 1, 1], [], []>} : vector<32x192xbf16>, vector<192x128xbf16>, vector<32x128xf32> -> vector<32x128xf32>
    %c0_3 = arith.constant 0 : index
    %c0_4 = arith.constant 0 : index
    %3 = vector.load %arg2[%c0_3, %c0_4] : memref<32x1xf32, #tpu.memory_space<vmem>>, vector<32x1xf32>
    %4 = vector.broadcast %3 : vector<32x1xf32> to vector<32x128xf32>
    %5 = arith.addf %2, %4 : vector<32x128xf32>
    %6 = vector.extract_strided_slice %5 {offsets = [0, 0], sizes = [24, 128], strides = [1, 1]} : vector<32x128xf32> to vector<24x128xf32>
    %c18_i32 = arith.constant 18 : i32
    %7 = tpu.dynamic_rotate %5 by %c18_i32 dim 1 : vector<32x128xf32>, i32 -> vector<32x128xf32>
    %c0_5 = arith.constant 0 : index
    %c0_6 = arith.constant 0 : index
    %8 = vector.load %arg5[%c0_5, %c0_6] : memref<25x128xf32, #tpu.memory_space<vmem>>, vector<1x128xf32>
    %9 = vector.broadcast %8 : vector<1x128xf32> to vector<32x128xf32>
    %10 = arith.mulf %7, %9 : vector<32x128xf32>
    %11 = arith.truncf %10 : vector<32x128xf32> to vector<32x128xbf16>
    %c0_7 = arith.constant 0 : index
    %c0_8 = arith.constant 0 : index
    %12 = vector.load %arg7[%c0_7, %c0_8] : memref<800x128xbf16, #tpu.memory_space<vmem>>, vector<32x128xbf16>
    tpu.vector_store %arg7[%c0_7, %c0_8], %11 {strides = array<i32>} : memref<800x128xbf16, #tpu.memory_space<vmem>>, vector<32x128xbf16>,
    %c17_i32 = arith.constant 17 : i32
    %13 = tpu.dynamic_rotate %5 by %c17_i32 dim 1 : vector<32x128xf32>, i32 -> vector<32x128xf32>
    %c1 = arith.constant 1 : index
    %c0_9 = arith.constant 0 : index
    %14 = vector.load %arg5[%c1, %c0_9] : memref<25x128xf32, #tpu.memory_space<vmem>>, vector<1x128xf32>
    %15 = vector.broadcast %14 : vector<1x128xf32> to vector<32x128xf32>
    %16 = arith.mulf %13, %15 : vector<32x128xf32>
    %17 = arith.truncf %16 : vector<32x128xf32> to vector<32x128xbf16>
    %c32 = arith.constant 32 : index
    %c0_10 = arith.constant 0 : index
    %18 = vector.load %arg7[%c32, %c0_10] : memref<800x128xbf16, #tpu.memory_space<vmem>>, vector<32x128xbf16>
    tpu.vector_store %arg7[%c32, %c0_10], %17 {strides = array<i32>} : memref<800x128xbf16, #tpu.memory_space<vmem>>, vector<32x128xbf16>,
    %c16_i32 = arith.constant 16 : i32
    %19 = tpu.dynamic_rotate %5 by %c16_i32 dim 1 : vector<32x128xf32>, i32 -> vector<32x128xf32>
    %c2 = arith.constant 2 : index
    %c0_11 = arith.constant 0 : index
    %20 = vector.load %arg5[%c2, %c0_11] : memref<25x128xf32, #tpu.memory_space<vmem>>, vector<1x128xf32>
    %21 = vector.broadcast %20 : vector<1x128xf32> to vector<32x128xf32>
    %22 = arith.mulf %19, %21 : vector<32x128xf32>
    %23 = arith.truncf %22 : vector<32x128xf32> to vector<32x128xbf16>
    %c64 = arith.constant 64 : index
    %c0_12 = arith.constant 0 : index
    %24 = vector.load %arg7[%c64, %c0_12] : memref<800x128xbf16, #tpu.memory_space<vmem>>, vector<32x128xbf16>
    tpu.vector_store %arg7[%c64, %c0_12], %23 {strides = array<i32>} : memref<800x128xbf16, #tpu.memory_space<vmem>>, vector<32x128xbf16>,
    %c15_i32 = arith.constant 15 : i32
    %25 = tpu.dynamic_rotate %5 by %c15_i32 dim 1 : vector<32x128xf32>, i32 -> vector<32x128xf32>
    %c3 = arith.constant 3 : index
    %c0_13 = arith.constant 0 : index
    %26 = vector.load %arg5[%c3, %c0_13] : memref<25x128xf32, #tpu.memory_space<vmem>>, vector<1x128xf32>
    %27 = vector.broadcast %26 : vector<1x128xf32> to vector<32x128xf32>
    %28 = arith.mulf %25, %27 : vector<32x128xf32>
    %29 = arith.truncf %28 : vector<32x128xf32> to vector<32x128xbf16>
    %c96 = arith.constant 96 : index
    %c0_14 = arith.constant 0 : index
    %30 = vector.load %arg7[%c96, %c0_14] : memref<800x128xbf16, #tpu.memory_space<vmem>>, vector<32x128xbf16>
    tpu.vector_store %arg7[%c96, %c0_14], %29 {strides = array<i32>} : memref<800x128xbf16, #tpu.memory_space<vmem>>, vector<32x128xbf16>,
    %c14_i32 = arith.constant 14 : i32
    %31 = tpu.dynamic_rotate %5 by %c14_i32 dim 1 : vector<32x128xf32>, i32 -> vector<32x128xf32>
    %c4 = arith.constant 4 : index
    %c0_15 = arith.constant 0 : index
    %32 = vector.load %arg5[%c4, %c0_15] : memref<25x128xf32, #tpu.memory_space<vmem>>, vector<1x128xf32>
    %33 = vector.broadcast %32 : vector<1x128xf32> to vector<32x128xf32>
    %34 = arith.mulf %31, %33 : vector<32x128xf32>
    %35 = arith.truncf %34 : vector<32x128xf32> to vector<32x128xbf16>
    %c128 = arith.constant 128 : index
    %c0_16 = arith.constant 0 : index
    %36 = vector.load %arg7[%c128, %c0_16] : memref<800x128xbf16, #tpu.memory_space<vmem>>, vector<32x128xbf16>
    tpu.vector_store %arg7[%c128, %c0_16], %35 {strides = array<i32>} : memref<800x128xbf16, #tpu.memory_space<vmem>>, vector<32x128xbf16>,
    %c10_i32 = arith.constant 10 : i32
    %37 = tpu.dynamic_rotate %5 by %c10_i32 dim 1 : vector<32x128xf32>, i32 -> vector<32x128xf32>
    %c5 = arith.constant 5 : index
    %c0_17 = arith.constant 0 : index
    %38 = vector.load %arg5[%c5, %c0_17] : memref<25x128xf32, #tpu.memory_space<vmem>>, vector<1x128xf32>
    %39 = vector.broadcast %38 : vector<1x128xf32> to vector<32x128xf32>
    %40 = arith.mulf %37, %39 : vector<32x128xf32>
    %41 = arith.truncf %40 : vector<32x128xf32> to vector<32x128xbf16>
    %c160 = arith.constant 160 : index
    %c0_18 = arith.constant 0 : index
    %42 = vector.load %arg7[%c160, %c0_18] : memref<800x128xbf16, #tpu.memory_space<vmem>>, vector<32x128xbf16>
    tpu.vector_store %arg7[%c160, %c0_18], %41 {strides = array<i32>} : memref<800x128xbf16, #tpu.memory_space<vmem>>, vector<32x128xbf16>,
    %c9_i32 = arith.constant 9 : i32
    %43 = tpu.dynamic_rotate %5 by %c9_i32 dim 1 : vector<32x128xf32>, i32 -> vector<32x128xf32>
    %c6 = arith.constant 6 : index
    %c0_19 = arith.constant 0 : index
    %44 = vector.load %arg5[%c6, %c0_19] : memref<25x128xf32, #tpu.memory_space<vmem>>, vector<1x128xf32>
    %45 = vector.broadcast %44 : vector<1x128xf32> to vector<32x128xf32>
    %46 = arith.mulf %43, %45 : vector<32x128xf32>
    %47 = arith.truncf %46 : vector<32x128xf32> to vector<32x128xbf16>
    %c192 = arith.constant 192 : index
    %c0_20 = arith.constant 0 : index
    %48 = vector.load %arg7[%c192, %c0_20] : memref<800x128xbf16, #tpu.memory_space<vmem>>, vector<32x128xbf16>
    tpu.vector_store %arg7[%c192, %c0_20], %47 {strides = array<i32>} : memref<800x128xbf16, #tpu.memory_space<vmem>>, vector<32x128xbf16>,
    %c8_i32 = arith.constant 8 : i32
    %49 = tpu.dynamic_rotate %5 by %c8_i32 dim 1 : vector<32x128xf32>, i32 -> vector<32x128xf32>
    %c7 = arith.constant 7 : index
    %c0_21 = arith.constant 0 : index
    %50 = vector.load %arg5[%c7, %c0_21] : memref<25x128xf32, #tpu.memory_space<vmem>>, vector<1x128xf32>
    %51 = vector.broadcast %50 : vector<1x128xf32> to vector<32x128xf32>
    %52 = arith.mulf %49, %51 : vector<32x128xf32>
    %53 = arith.truncf %52 : vector<32x128xf32> to vector<32x128xbf16>
    %c224 = arith.constant 224 : index
    %c0_22 = arith.constant 0 : index
    %54 = vector.load %arg7[%c224, %c0_22] : memref<800x128xbf16, #tpu.memory_space<vmem>>, vector<32x128xbf16>
    tpu.vector_store %arg7[%c224, %c0_22], %53 {strides = array<i32>} : memref<800x128xbf16, #tpu.memory_space<vmem>>, vector<32x128xbf16>,
    %c7_i32 = arith.constant 7 : i32
    %55 = tpu.dynamic_rotate %5 by %c7_i32 dim 1 : vector<32x128xf32>, i32 -> vector<32x128xf32>
    %c8 = arith.constant 8 : index
    %c0_23 = arith.constant 0 : index
    %56 = vector.load %arg5[%c8, %c0_23] : memref<25x128xf32, #tpu.memory_space<vmem>>, vector<1x128xf32>
    %57 = vector.broadcast %56 : vector<1x128xf32> to vector<32x128xf32>
    %58 = arith.mulf %55, %57 : vector<32x128xf32>
    %59 = arith.truncf %58 : vector<32x128xf32> to vector<32x128xbf16>
    %c256 = arith.constant 256 : index
    %c0_24 = arith.constant 0 : index
    %60 = vector.load %arg7[%c256, %c0_24] : memref<800x128xbf16, #tpu.memory_space<vmem>>, vector<32x128xbf16>
    tpu.vector_store %arg7[%c256, %c0_24], %59 {strides = array<i32>} : memref<800x128xbf16, #tpu.memory_space<vmem>>, vector<32x128xbf16>,
    %c6_i32 = arith.constant 6 : i32
    %61 = tpu.dynamic_rotate %5 by %c6_i32 dim 1 : vector<32x128xf32>, i32 -> vector<32x128xf32>
    %c9 = arith.constant 9 : index
    %c0_25 = arith.constant 0 : index
    %62 = vector.load %arg5[%c9, %c0_25] : memref<25x128xf32, #tpu.memory_space<vmem>>, vector<1x128xf32>
    %63 = vector.broadcast %62 : vector<1x128xf32> to vector<32x128xf32>
    %64 = arith.mulf %61, %63 : vector<32x128xf32>
    %65 = arith.truncf %64 : vector<32x128xf32> to vector<32x128xbf16>
    %c288 = arith.constant 288 : index
    %c0_26 = arith.constant 0 : index
    %66 = vector.load %arg7[%c288, %c0_26] : memref<800x128xbf16, #tpu.memory_space<vmem>>, vector<32x128xbf16>
    tpu.vector_store %arg7[%c288, %c0_26], %65 {strides = array<i32>} : memref<800x128xbf16, #tpu.memory_space<vmem>>, vector<32x128xbf16>,
    %c2_i32 = arith.constant 2 : i32
    %67 = tpu.dynamic_rotate %5 by %c2_i32 dim 1 : vector<32x128xf32>, i32 -> vector<32x128xf32>
    %c10 = arith.constant 10 : index
    %c0_27 = arith.constant 0 : index
    %68 = vector.load %arg5[%c10, %c0_27] : memref<25x128xf32, #tpu.memory_space<vmem>>, vector<1x128xf32>
    %69 = vector.broadcast %68 : vector<1x128xf32> to vector<32x128xf32>
    %70 = arith.mulf %67, %69 : vector<32x128xf32>
    %71 = arith.truncf %70 : vector<32x128xf32> to vector<32x128xbf16>
    %c320 = arith.constant 320 : index
    %c0_28 = arith.constant 0 : index
    %72 = vector.load %arg7[%c320, %c0_28] : memref<800x128xbf16, #tpu.memory_space<vmem>>, vector<32x128xbf16>
    tpu.vector_store %arg7[%c320, %c0_28], %71 {strides = array<i32>} : memref<800x128xbf16, #tpu.memory_space<vmem>>, vector<32x128xbf16>,
    %c1_i32 = arith.constant 1 : i32
    %73 = tpu.dynamic_rotate %5 by %c1_i32 dim 1 : vector<32x128xf32>, i32 -> vector<32x128xf32>
    %c11 = arith.constant 11 : index
    %c0_29 = arith.constant 0 : index
    %74 = vector.load %arg5[%c11, %c0_29] : memref<25x128xf32, #tpu.memory_space<vmem>>, vector<1x128xf32>
    %75 = vector.broadcast %74 : vector<1x128xf32> to vector<32x128xf32>
    %76 = arith.mulf %73, %75 : vector<32x128xf32>
    %77 = arith.truncf %76 : vector<32x128xf32> to vector<32x128xbf16>
    %c352 = arith.constant 352 : index
    %c0_30 = arith.constant 0 : index
    %78 = vector.load %arg7[%c352, %c0_30] : memref<800x128xbf16, #tpu.memory_space<vmem>>, vector<32x128xbf16>
    tpu.vector_store %arg7[%c352, %c0_30], %77 {strides = array<i32>} : memref<800x128xbf16, #tpu.memory_space<vmem>>, vector<32x128xbf16>,
    %79 = arith.truncf %5 : vector<32x128xf32> to vector<32x128xbf16>
    %c384 = arith.constant 384 : index
    %c0_31 = arith.constant 0 : index
    %80 = vector.load %arg7[%c384, %c0_31] : memref<800x128xbf16, #tpu.memory_space<vmem>>, vector<32x128xbf16>
    tpu.vector_store %arg7[%c384, %c0_31], %79 {strides = array<i32>} : memref<800x128xbf16, #tpu.memory_space<vmem>>, vector<32x128xbf16>,
    %c127_i32 = arith.constant 127 : i32
    %81 = tpu.dynamic_rotate %5 by %c127_i32 dim 1 : vector<32x128xf32>, i32 -> vector<32x128xf32>
    %c13 = arith.constant 13 : index
    %c0_32 = arith.constant 0 : index
    %82 = vector.load %arg5[%c13, %c0_32] : memref<25x128xf32, #tpu.memory_space<vmem>>, vector<1x128xf32>
    %83 = vector.broadcast %82 : vector<1x128xf32> to vector<32x128xf32>
    %84 = arith.mulf %81, %83 : vector<32x128xf32>
    %85 = arith.truncf %84 : vector<32x128xf32> to vector<32x128xbf16>
    %c416 = arith.constant 416 : index
    %c0_33 = arith.constant 0 : index
    %86 = vector.load %arg7[%c416, %c0_33] : memref<800x128xbf16, #tpu.memory_space<vmem>>, vector<32x128xbf16>
    tpu.vector_store %arg7[%c416, %c0_33], %85 {strides = array<i32>} : memref<800x128xbf16, #tpu.memory_space<vmem>>, vector<32x128xbf16>,
    %c126_i32 = arith.constant 126 : i32
    %87 = tpu.dynamic_rotate %5 by %c126_i32 dim 1 : vector<32x128xf32>, i32 -> vector<32x128xf32>
    %c14 = arith.constant 14 : index
    %c0_34 = arith.constant 0 : index
    %88 = vector.load %arg5[%c14, %c0_34] : memref<25x128xf32, #tpu.memory_space<vmem>>, vector<1x128xf32>
    %89 = vector.broadcast %88 : vector<1x128xf32> to vector<32x128xf32>
    %90 = arith.mulf %87, %89 : vector<32x128xf32>
    %91 = arith.truncf %90 : vector<32x128xf32> to vector<32x128xbf16>
    %c448 = arith.constant 448 : index
    %c0_35 = arith.constant 0 : index
    %92 = vector.load %arg7[%c448, %c0_35] : memref<800x128xbf16, #tpu.memory_space<vmem>>, vector<32x128xbf16>
    tpu.vector_store %arg7[%c448, %c0_35], %91 {strides = array<i32>} : memref<800x128xbf16, #tpu.memory_space<vmem>>, vector<32x128xbf16>,
    %c122_i32 = arith.constant 122 : i32
    %93 = tpu.dynamic_rotate %5 by %c122_i32 dim 1 : vector<32x128xf32>, i32 -> vector<32x128xf32>
    %c15 = arith.constant 15 : index
    %c0_36 = arith.constant 0 : index
    %94 = vector.load %arg5[%c15, %c0_36] : memref<25x128xf32, #tpu.memory_space<vmem>>, vector<1x128xf32>
    %95 = vector.broadcast %94 : vector<1x128xf32> to vector<32x128xf32>
    %96 = arith.mulf %93, %95 : vector<32x128xf32>
    %97 = arith.truncf %96 : vector<32x128xf32> to vector<32x128xbf16>
    %c480 = arith.constant 480 : index
    %c0_37 = arith.constant 0 : index
    %98 = vector.load %arg7[%c480, %c0_37] : memref<800x128xbf16, #tpu.memory_space<vmem>>, vector<32x128xbf16>
    tpu.vector_store %arg7[%c480, %c0_37], %97 {strides = array<i32>} : memref<800x128xbf16, #tpu.memory_space<vmem>>, vector<32x128xbf16>,
    %c121_i32 = arith.constant 121 : i32
    %99 = tpu.dynamic_rotate %5 by %c121_i32 dim 1 : vector<32x128xf32>, i32 -> vector<32x128xf32>
    %c16 = arith.constant 16 : index
    %c0_38 = arith.constant 0 : index
    %100 = vector.load %arg5[%c16, %c0_38] : memref<25x128xf32, #tpu.memory_space<vmem>>, vector<1x128xf32>
    %101 = vector.broadcast %100 : vector<1x128xf32> to vector<32x128xf32>
    %102 = arith.mulf %99, %101 : vector<32x128xf32>
    %103 = arith.truncf %102 : vector<32x128xf32> to vector<32x128xbf16>
    %c512 = arith.constant 512 : index
    %c0_39 = arith.constant 0 : index
    %104 = vector.load %arg7[%c512, %c0_39] : memref<800x128xbf16, #tpu.memory_space<vmem>>, vector<32x128xbf16>
    tpu.vector_store %arg7[%c512, %c0_39], %103 {strides = array<i32>} : memref<800x128xbf16, #tpu.memory_space<vmem>>, vector<32x128xbf16>,
    %c120_i32 = arith.constant 120 : i32
    %105 = tpu.dynamic_rotate %5 by %c120_i32 dim 1 : vector<32x128xf32>, i32 -> vector<32x128xf32>
    %c17 = arith.constant 17 : index
    %c0_40 = arith.constant 0 : index
    %106 = vector.load %arg5[%c17, %c0_40] : memref<25x128xf32, #tpu.memory_space<vmem>>, vector<1x128xf32>
    %107 = vector.broadcast %106 : vector<1x128xf32> to vector<32x128xf32>
    %108 = arith.mulf %105, %107 : vector<32x128xf32>
    %109 = arith.truncf %108 : vector<32x128xf32> to vector<32x128xbf16>
    %c544 = arith.constant 544 : index
    %c0_41 = arith.constant 0 : index
    %110 = vector.load %arg7[%c544, %c0_41] : memref<800x128xbf16, #tpu.memory_space<vmem>>, vector<32x128xbf16>
    tpu.vector_store %arg7[%c544, %c0_41], %109 {strides = array<i32>} : memref<800x128xbf16, #tpu.memory_space<vmem>>, vector<32x128xbf16>,
    %c119_i32 = arith.constant 119 : i32
    %111 = tpu.dynamic_rotate %5 by %c119_i32 dim 1 : vector<32x128xf32>, i32 -> vector<32x128xf32>
    %c18 = arith.constant 18 : index
    %c0_42 = arith.constant 0 : index
    %112 = vector.load %arg5[%c18, %c0_42] : memref<25x128xf32, #tpu.memory_space<vmem>>, vector<1x128xf32>
    %113 = vector.broadcast %112 : vector<1x128xf32> to vector<32x128xf32>
    %114 = arith.mulf %111, %113 : vector<32x128xf32>
    %115 = arith.truncf %114 : vector<32x128xf32> to vector<32x128xbf16>
    %c576 = arith.constant 576 : index
    %c0_43 = arith.constant 0 : index
    %116 = vector.load %arg7[%c576, %c0_43] : memref<800x128xbf16, #tpu.memory_space<vmem>>, vector<32x128xbf16>
    tpu.vector_store %arg7[%c576, %c0_43], %115 {strides = array<i32>} : memref<800x128xbf16, #tpu.memory_space<vmem>>, vector<32x128xbf16>,
    %c118_i32 = arith.constant 118 : i32
    %117 = tpu.dynamic_rotate %5 by %c118_i32 dim 1 : vector<32x128xf32>, i32 -> vector<32x128xf32>
    %c19 = arith.constant 19 : index
    %c0_44 = arith.constant 0 : index
    %118 = vector.load %arg5[%c19, %c0_44] : memref<25x128xf32, #tpu.memory_space<vmem>>, vector<1x128xf32>
    %119 = vector.broadcast %118 : vector<1x128xf32> to vector<32x128xf32>
    %120 = arith.mulf %117, %119 : vector<32x128xf32>
    %121 = arith.truncf %120 : vector<32x128xf32> to vector<32x128xbf16>
    %c608 = arith.constant 608 : index
    %c0_45 = arith.constant 0 : index
    %122 = vector.load %arg7[%c608, %c0_45] : memref<800x128xbf16, #tpu.memory_space<vmem>>, vector<32x128xbf16>
    tpu.vector_store %arg7[%c608, %c0_45], %121 {strides = array<i32>} : memref<800x128xbf16, #tpu.memory_space<vmem>>, vector<32x128xbf16>,
    %c114_i32 = arith.constant 114 : i32
    %123 = tpu.dynamic_rotate %5 by %c114_i32 dim 1 : vector<32x128xf32>, i32 -> vector<32x128xf32>
    %c20 = arith.constant 20 : index
    %c0_46 = arith.constant 0 : index
    %124 = vector.load %arg5[%c20, %c0_46] : memref<25x128xf32, #tpu.memory_space<vmem>>, vector<1x128xf32>
    %125 = vector.broadcast %124 : vector<1x128xf32> to vector<32x128xf32>
    %126 = arith.mulf %123, %125 : vector<32x128xf32>
    %127 = arith.truncf %126 : vector<32x128xf32> to vector<32x128xbf16>
    %c640 = arith.constant 640 : index
    %c0_47 = arith.constant 0 : index
    %128 = vector.load %arg7[%c640, %c0_47] : memref<800x128xbf16, #tpu.memory_space<vmem>>, vector<32x128xbf16>
    tpu.vector_store %arg7[%c640, %c0_47], %127 {strides = array<i32>} : memref<800x128xbf16, #tpu.memory_space<vmem>>, vector<32x128xbf16>,
    %c113_i32 = arith.constant 113 : i32
    %129 = tpu.dynamic_rotate %5 by %c113_i32 dim 1 : vector<32x128xf32>, i32 -> vector<32x128xf32>
    %c21 = arith.constant 21 : index
    %c0_48 = arith.constant 0 : index
    %130 = vector.load %arg5[%c21, %c0_48] : memref<25x128xf32, #tpu.memory_space<vmem>>, vector<1x128xf32>
    %131 = vector.broadcast %130 : vector<1x128xf32> to vector<32x128xf32>
    %132 = arith.mulf %129, %131 : vector<32x128xf32>
    %133 = arith.truncf %132 : vector<32x128xf32> to vector<32x128xbf16>
    %c672 = arith.constant 672 : index
    %c0_49 = arith.constant 0 : index
    %134 = vector.load %arg7[%c672, %c0_49] : memref<800x128xbf16, #tpu.memory_space<vmem>>, vector<32x128xbf16>
    tpu.vector_store %arg7[%c672, %c0_49], %133 {strides = array<i32>} : memref<800x128xbf16, #tpu.memory_space<vmem>>, vector<32x128xbf16>,
    %c112_i32 = arith.constant 112 : i32
    %135 = tpu.dynamic_rotate %5 by %c112_i32 dim 1 : vector<32x128xf32>, i32 -> vector<32x128xf32>
    %c22 = arith.constant 22 : index
    %c0_50 = arith.constant 0 : index
    %136 = vector.load %arg5[%c22, %c0_50] : memref<25x128xf32, #tpu.memory_space<vmem>>, vector<1x128xf32>
    %137 = vector.broadcast %136 : vector<1x128xf32> to vector<32x128xf32>
    %138 = arith.mulf %135, %137 : vector<32x128xf32>
    %139 = arith.truncf %138 : vector<32x128xf32> to vector<32x128xbf16>
    %c704 = arith.constant 704 : index
    %c0_51 = arith.constant 0 : index
    %140 = vector.load %arg7[%c704, %c0_51] : memref<800x128xbf16, #tpu.memory_space<vmem>>, vector<32x128xbf16>
    tpu.vector_store %arg7[%c704, %c0_51], %139 {strides = array<i32>} : memref<800x128xbf16, #tpu.memory_space<vmem>>, vector<32x128xbf16>,
    %c111_i32 = arith.constant 111 : i32
    %141 = tpu.dynamic_rotate %5 by %c111_i32 dim 1 : vector<32x128xf32>, i32 -> vector<32x128xf32>
    %c23 = arith.constant 23 : index
    %c0_52 = arith.constant 0 : index
    %142 = vector.load %arg5[%c23, %c0_52] : memref<25x128xf32, #tpu.memory_space<vmem>>, vector<1x128xf32>
    %143 = vector.broadcast %142 : vector<1x128xf32> to vector<32x128xf32>
    %144 = arith.mulf %141, %143 : vector<32x128xf32>
    %145 = arith.truncf %144 : vector<32x128xf32> to vector<32x128xbf16>
    %c736 = arith.constant 736 : index
    %c0_53 = arith.constant 0 : index
    %146 = vector.load %arg7[%c736, %c0_53] : memref<800x128xbf16, #tpu.memory_space<vmem>>, vector<32x128xbf16>
    tpu.vector_store %arg7[%c736, %c0_53], %145 {strides = array<i32>} : memref<800x128xbf16, #tpu.memory_space<vmem>>, vector<32x128xbf16>,
    %c110_i32 = arith.constant 110 : i32
    %147 = tpu.dynamic_rotate %5 by %c110_i32 dim 1 : vector<32x128xf32>, i32 -> vector<32x128xf32>
    %c24 = arith.constant 24 : index
    %c0_54 = arith.constant 0 : index
    %148 = vector.load %arg5[%c24, %c0_54] : memref<25x128xf32, #tpu.memory_space<vmem>>, vector<1x128xf32>
    %149 = vector.broadcast %148 : vector<1x128xf32> to vector<32x128xf32>
    %150 = arith.mulf %147, %149 : vector<32x128xf32>
    %151 = arith.truncf %150 : vector<32x128xf32> to vector<32x128xbf16>
    %c768 = arith.constant 768 : index
    %c0_55 = arith.constant 0 : index
    %152 = vector.load %arg7[%c768, %c0_55] : memref<800x128xbf16, #tpu.memory_space<vmem>>, vector<32x128xbf16>
    tpu.vector_store %arg7[%c768, %c0_55], %151 {strides = array<i32>} : memref<800x128xbf16, #tpu.memory_space<vmem>>, vector<32x128xbf16>,
    %c0_56 = arith.constant 0 : index
    %c0_57 = arith.constant 0 : index
    %153 = vector.load %arg3[%c0_56, %c0_57] : memref<24x800xbf16, #tpu.memory_space<vmem>>, vector<24x800xbf16>
    %c0_58 = arith.constant 0 : index
    %c0_59 = arith.constant 0 : index
    %154 = vector.load %arg7[%c0_58, %c0_59] : memref<800x128xbf16, #tpu.memory_space<vmem>>, vector<800x128xbf16>
    %cst_60 = arith.constant dense<0.000000e+00> : vector<24x128xf32>
    %155 = tpu.matmul %153, %154, %cst_60 {dimension_numbers = #tpu.dot_dimension_numbers<[1], [0], [0], [1], [0, 0, 1, 1], [], []>} : vector<24x800xbf16>, vector<800x128xbf16>, vector<24x128xf32> -> vector<24x128xf32>
    %c0_61 = arith.constant 0 : index
    %c0_62 = arith.constant 0 : index
    %156 = vector.load %arg4[%c0_61, %c0_62] : memref<24x1xf32, #tpu.memory_space<vmem>>, vector<24x1xf32>
    %157 = vector.broadcast %156 : vector<24x1xf32> to vector<24x128xf32>
    %158 = arith.addf %155, %157 : vector<24x128xf32>
    %cst_63 = arith.constant 5.000000e-01 : f32
    %159 = vector.broadcast %cst_63 : f32 to vector<24x128xf32>
    %160 = arith.subf %6, %159 : vector<24x128xf32>
    %161 = arith.subf %158, %160 : vector<24x128xf32>
    %cst_64 = arith.constant 0.707106769 : f32
    %162 = vector.broadcast %cst_64 : f32 to vector<24x128xf32>
    %163 = arith.mulf %161, %162 : vector<24x128xf32>
    %164 = math.absf %163 : vector<24x128xf32>
    %cst_65 = arith.constant 0.327591091 : f32
    %165 = vector.broadcast %cst_65 : f32 to vector<24x128xf32>
    %166 = arith.mulf %165, %164 : vector<24x128xf32>
    %cst_66 = arith.constant 1.000000e+00 : f32
    %167 = vector.broadcast %cst_66 : f32 to vector<24x128xf32>
    %168 = arith.addf %167, %166 : vector<24x128xf32>
    %cst_67 = arith.constant 1.000000e+00 : f32
    %169 = vector.broadcast %cst_67 : f32 to vector<24x128xf32>
    %170 = arith.divf %169, %168 : vector<24x128xf32>
    %cst_68 = arith.constant 1.06140542 : f32
    %171 = vector.broadcast %cst_68 : f32 to vector<24x128xf32>
    %172 = arith.mulf %171, %170 : vector<24x128xf32>
    %cst_69 = arith.constant 1.45315206 : f32
    %173 = vector.broadcast %cst_69 : f32 to vector<24x128xf32>
    %174 = arith.subf %172, %173 : vector<24x128xf32>
    %175 = arith.mulf %174, %170 : vector<24x128xf32>
    %cst_70 = arith.constant 1.42141378 : f32
    %176 = vector.broadcast %cst_70 : f32 to vector<24x128xf32>
    %177 = arith.addf %175, %176 : vector<24x128xf32>
    %178 = arith.mulf %177, %170 : vector<24x128xf32>
    %cst_71 = arith.constant 0.284496725 : f32
    %179 = vector.broadcast %cst_71 : f32 to vector<24x128xf32>
    %180 = arith.subf %178, %179 : vector<24x128xf32>
    %181 = arith.mulf %180, %170 : vector<24x128xf32>
    %cst_72 = arith.constant 0.254829586 : f32
    %182 = vector.broadcast %cst_72 : f32 to vector<24x128xf32>
    %183 = arith.addf %181, %182 : vector<24x128xf32>
    %184 = arith.mulf %183, %170 : vector<24x128xf32>
    %cst_73 = arith.constant 0.000000e+00 : f32
    %185 = vector.broadcast %cst_73 : f32 to vector<24x128xf32>
    %186 = arith.subf %185, %164 : vector<24x128xf32>
    %187 = arith.mulf %186, %164 : vector<24x128xf32>
    %188 = math.exp %187 : vector<24x128xf32>
    %189 = arith.mulf %184, %188 : vector<24x128xf32>
    %cst_74 = arith.constant 0.000000e+00 : f32
    %190 = vector.broadcast %cst_74 : f32 to vector<24x128xf32>
    %191 = arith.cmpf oge, %163, %190 : vector<24x128xf32>
    %cst_75 = arith.constant 0.000000e+00 : f32
    %192 = vector.broadcast %cst_75 : f32 to vector<24x128xf32>
    %193 = arith.subf %192, %189 : vector<24x128xf32>
    %cst_76 = arith.constant 2.000000e+00 : f32
    %194 = vector.broadcast %cst_76 : f32 to vector<24x128xf32>
    %195 = arith.subf %189, %194 : vector<24x128xf32>
    %196 = arith.select %191, %193, %195 : vector<24x128xi1>, vector<24x128xf32>
    %cst_77 = arith.constant 5.000000e-01 : f32
    %197 = vector.broadcast %cst_77 : f32 to vector<24x128xf32>
    %198 = arith.mulf %197, %161 : vector<24x128xf32>
    %199 = arith.mulf %198, %196 : vector<24x128xf32>
    %200 = vector.extract_strided_slice %199 {offsets = [0, 0], sizes = [24, 64], strides = [1, 1]} : vector<24x128xf32> to vector<24x64xf32>
    %c0_78 = arith.constant 0 : index
    %c0_79 = arith.constant 0 : index
    %c0_80 = arith.constant 0 : index
    %201 = vector.load %arg6[%c0_78, %c0_79, %c0_80] : memref<2x24x64xf32, #tpu.memory_space<vmem>>, vector<1x24x64xf32>
    %202 = vector.shape_cast %201 : vector<1x24x64xf32> to vector<24x64xf32>
    %203 = vector.shape_cast %200 : vector<24x64xf32> to vector<1x24x64xf32>
    tpu.vector_store %arg6[%c0_78, %c0_79, %c0_80], %203 {strides = array<i32>} : memref<2x24x64xf32, #tpu.memory_space<vmem>>, vector<1x24x64xf32>,
    %204 = vector.extract_strided_slice %199 {offsets = [0, 64], sizes = [24, 64], strides = [1, 1]} : vector<24x128xf32> to vector<24x64xf32>
    %c1_81 = arith.constant 1 : index
    %c0_82 = arith.constant 0 : index
    %c0_83 = arith.constant 0 : index
    %205 = vector.load %arg6[%c1_81, %c0_82, %c0_83] : memref<2x24x64xf32, #tpu.memory_space<vmem>>, vector<1x24x64xf32>
    %206 = vector.shape_cast %205 : vector<1x24x64xf32> to vector<24x64xf32>
    %207 = vector.shape_cast %204 : vector<24x64xf32> to vector<1x24x64xf32>
    tpu.vector_store %arg6[%c1_81, %c0_82, %c0_83], %207 {strides = array<i32>} : memref<2x24x64xf32, #tpu.memory_space<vmem>>, vector<1x24x64xf32>,
    return
  }
}

</mosaic_0001>

<bundles_post_ra>
// kernel: model_forward.1
= control target key start
LH: loop header
LB: loop body
LE: loop exit
PB: predicated region body
PF: predicated region fallthrough
CT: control target
= control target key end

     0   :  { %v2768_v0 = vmov 0   ;;  %vm166_vm0 = vcmask 523264   ;;  %s2771_s12 = smov 9   ;;  %s2772_s13 = smov 16   ;;  %vm1619_vm1 = vcmask 261120   ;;  %s3386_s0 = inlined_call_operand.vmem [shape: bf16[192,128], index: 0, kind: input, shape index: {}]   ;;  %s3387_s1 = inlined_call_operand.vmem [shape: bf16[32,192], index: 1, kind: input, shape index: {}]   ;;  %s3388_s2 = inlined_call_operand.vmem [shape: f32[32,1], index: 2, kind: input, shape index: {}]   ;;  %s3389_s5 = inlined_call_operand.vmem [shape: f32[25,128], index: 5, kind: input, shape index: {}]   ;;  %s3390_s3 = inlined_call_operand.vmem [shape: bf16[24,800], index: 3, kind: input, shape index: {}]   ;;  %s3391_s4 = inlined_call_operand.vmem [shape: f32[24,1], index: 4, kind: input, shape index: {}]   ;;  %s3392_s6 = inlined_call_operand.vmem [shape: f32[2,24,64], index: 6, kind: output, shape index: {}]  }
   0x1   :  { %173 = vmatprep.subr.bf16.mxu0 %v2768_v0  ;;  %v2671_v1 = vld [vmem:[%s3386_s0 + $0x38] sm:$0xff]   ;;  %2670 = vset.pattern.permute.xlu1 %v2768_v0  ;;  %v2672_v2 = vld [vmem:[%s3386_s0 + $0x30] sm:$0xff]   ;;  %v2673_v3 = vld [vmem:[%s3386_s0 + $0x28] sm:$0xff]   ;;  %s2773_s14 = smov 10   ;;  %s2774_s15 = smov 17  }
   0x2   :  { %2669 = vset.pattern.permute.xlu0 %v2768_v0  ;;  %174 = vmatpush1.bf16.msra.mxu0 %v2671_v1  ;;  %v2674_v4 = vld [vmem:[%s3386_s0 + $0x20] sm:$0xff]   ;;  %v2675_v7 = vld [vmem:[%s3386_s0 + $0x18] sm:$0xff]   ;;  %v53_v8 = vld [vmem:[%s3388_s2 + $0x8] sm:$0xff]  ;;  %s2775_s16 = smov 14   ;;  %s2776_s17 = smov 18  }
   0x3   :  { %175 = vmatprep.subr.bf16.mxu0 %v2768_v0  ;;  %v2685_v5 = vld [vmem:[%s3387_s1 + $0x4] ss:$8 sps:$4 sm:$0xff]   ;;  %v54_v9 = vld [vmem:[%s3388_s2 + $0x10] sm:$0xff]  ;;  %v55_v10 = vld [vmem:[%s3388_s2 + $0x18] sm:$0xff]  ;;  %s2777_s18 = smov 122   ;;  %s2778_s19 = smov 1  }
   0x4   :  { %v52_v6 = vld [vmem:[%s3388_s2] sm:$0xff]  ;;  %1941 = vmatprep.mubr.msk.bf16.mxu0 %vm166_vm0, %v2685_v5  ;;  %68 = vperm.xlu0 %2669, %v54_v9   ;;  %v2676_v11 = vld [vmem:[%s3386_s0 + $0x10] sm:$0xff]   ;;  %v2677_v12 = vld [vmem:[%s3386_s0 + $0x8] sm:$0xff]   ;;  %s2779_s20 = smov 126   ;;  %s2780_s21 = smov 111  }
   0x5   :  { %58 = vperm.xlu1 %2670, %v52_v6   ;;  %v2678_v13 = vld [vmem:[%s3386_s0] sm:$0xff]   ;;  %v2679_v14 = vld [vmem:[%s3386_s0 + $0x58] sm:$0xff]   ;;  %v2680_v15 = vld [vmem:[%s3386_s0 + $0x50] sm:$0xff]   ;;  %s2781_s22 = smov 2   ;;  %s2782_s2 = smov 118  }
   0x6   :  { %176 = vmatpush1.bf16.msra.mxu0 %v2672_v2  ;;  %v2681_v16 = vld [vmem:[%s3386_s0 + $0x48] sm:$0xff]   ;;  %v2682_v17 = vld [vmem:[%s3386_s0 + $0x40] sm:$0xff]   ;;  %v2686_v19 = vld [vmem:[%s3387_s1 + $0x14] ss:$8 sps:$4 sm:$0xff]   ;;  %s2769_s0 = smov 8   ;;  %s2783_s23 = smov 127  }
   0x7   :  { %177 = vmatprep.subr.bf16.mxu0 %v2768_v0  ;;  %v2683_v18 = vld [vmem:[%s3387_s1] ss:$8 sps:$4 sm:$0xff]   ;;  %v2688_v20 = vld [vmem:[%s3387_s1 + $0x10] ss:$8 sps:$4 sm:$0xff]   ;;  %s2770_s1 = smov 15   ;;  %s2784_s24 = smov 112  }
   0x8   :  { %73 = vperm.xlu0 %2669, %v55_v10   ;;  %s2785_s25 = smov 6   ;;  %s2786_s26 = smov 119   ;;  %v3020_v40 = vld [vmem:[%s3389_s5 + $0x7] ss:$0 sm:$0xff]  ;;  %v3031_v45 = vld [vmem:[%s3389_s5 + $0x3] ss:$0 sm:$0xff] }
   0x9   :  { %63 = vperm.xlu1 %2670, %v53_v8   ;;  %s2787_s27 = smov 113   ;;  %s2788_s28 = smov 7   ;;  %v3042_v51 = vld [vmem:[%s3389_s5 + $0x6] ss:$0 sm:$0xff]  ;;  %v3056_v58 = vld [vmem:[%s3389_s5 + $0x2] ss:$0 sm:$0xff] }
   0xa   :  { %178 = vmatpush1.bf16.msra.mxu0 %v2673_v3  ;;  %s2789_s29 = smov 120   ;;  %s2790_s30 = smov 114   ;;  %v2708_v53 = vld [vmem:[%s3390_s3 + $0x4] ss:$28 sps:$4 sm:$0xff]  }
   0xb   :  { %179 = vmatprep.subr.bf16.mxu0 %v2768_v0  ;;  %1658 = vmatprep.mubr.bf16.mxu1 %v2708_v53  ;;  %v3078_v6 = vld [vmem:[%s3389_s5 + $0x1] ss:$0 sm:$0xff] }
   0xe   :  { %180 = vmatpush1.bf16.msra.mxu0 %v2674_v4 }
   0xf   :  { %181 = vmatprep.subr.bf16.mxu0 %v2768_v0 }
  0x12   :  { %182 = vmatpush1.bf16.msra.mxu0 %v2675_v7 }
  0x13   :  { %183 = vmatprep.subr.bf16.mxu0 %v2768_v0 }
  0x16   :  { %184 = vmatpush1.bf16.msra.mxu0 %v2676_v11 }
  0x17   :  { %185 = vmatprep.subr.bf16.mxu0 %v2768_v0 }
  0x1a   :  { %186 = vmatpush1.bf16.msra.mxu0 %v2677_v12  ;;  %v3089_v12 = vld [vmem:[%s3389_s5 + $0x4] ss:$0 sm:$0xff] }
  0x1b   :  { %187 = vmatprep.subr.bf16.mxu0 %v2768_v0 }
  0x1e   :  { %188 = vmatpush1.bf16.msra.mxu0 %v2678_v13 }
  0x1f   :  { %197 = vmatprep.subr.bf16.mxu0 %v2768_v0 }
  0x22   :  { %198 = vmatpush2.bf16.msra.mxu0 %v2679_v14 }
  0x23   :  { %199 = vmatprep.subr.bf16.mxu0 %v2768_v0 }
  0x26   :  { %200 = vmatpush2.bf16.msra.mxu0 %v2680_v15 }
  0x27   :  { %201 = vmatprep.subr.bf16.mxu0 %v2768_v0 }
  0x2a   :  { %202 = vmatpush2.bf16.msra.mxu0 %v2681_v16 }
  0x2b   :  { %203 = vmatprep.subr.bf16.mxu0 %v2768_v0  ;;  %v3067_v0 = vld [vmem:[%s3389_s5 + $0x5] ss:$0 sm:$0xff] }
  0x2e   :  { %204 = vmatpush2.bf16.msra.mxu0 %v2682_v17 }
  0x31   :  { %206 = vmatmul.mubr.bf16.vlgmr.msra.gmra.mxu0 %v2683_v18  ;;  %v3100_v18 = vld [vmem:[%s3389_s5] ss:$0 sm:$0xff] }
  0x32   :  { %1942 = vmatprep.mubr.msk.bf16.mxu0 %vm166_vm0, %v2686_v19 }
  0x39   :  { %214 = vmatmul.mubr.bf16.gmra.mxu0 %v2688_v20 }
  0x7f   :  { %v69_v27 = vpop.permute.xlu0 %68 }
  0x80   :  { %v59_v21 = vpop.permute.xlu1 %58 }
  0x83   :  { %v74_v33 = vpop.permute.xlu0 %73 }
  0x84   :  { %v64_v25 = vpop.permute.xlu1 %63 }
  0xf1   :  { %v207_v22 = vpop.f32.mrf.mxu0 }
  0xf2   :  { %v2891_v23 = vadd.f32 %v207_v22, %v59_v21 }
  0xf3   :  { %v209_v24 = vpop.f32.mrf.mxu0 }
  0xf4   :  { %481 = vrot.lane.b32.xlu0 %v2891_v23, %s2769_s0 }
  0xf5   :  { %v210_v26 = vpop.f32.mrf.mxu0 }
  0xf6   :  { %v2895_v28 = vadd.f32 %v210_v26, %v64_v25  ;;  %v3111_v25 = vld [vmem:[%s3389_s5 + $0xf] ss:$0 sm:$0xff] }
  0xf7   :  { %v212_v29 = vpop.f32.mrf.mxu0 }
  0xf8   :  { %483 = vrot.lane.b32.xlu1 %v2895_v28, %s2769_s0  ;;  %333 = vrot.lane.b32.xlu0 %v2891_v23, %s2770_s1  ;;  %v2371_v30 = vpack.c.bf16 %v2895_v28, %v2891_v23 }
  0xf9   :  { %v215_v31 = vpop.f32.mrf.mxu0 }
  0xfa   :  { %2521 = vst [vmem:[#allocation2 + $0xc0] sm:$0xff] %v2371_v30   ;;  %v2907_v34 = vadd.f32 %v215_v31, %v69_v27 }
  0xfb   :  { %v217_v32 = vpop.f32.mrf.mxu0 }
  0xfc   :  { %335 = vrot.lane.b32.xlu1 %v2895_v28, %s2770_s1  ;;  %444 = vrot.lane.b32.xlu0 %v2891_v23, %s2771_s12  ;;  %v3122_v32 = vld [vmem:[%s3389_s5 + $0xb] ss:$0 sm:$0xff] }
  0xfd   :  { %v218_v35 = vpop.f32.mrf.mxu0 }
  0xfe   :  { %v2909_v36 = vadd.f32 %v218_v35, %v74_v33 }
  0xff   :  { %v220_v37 = vpop.f32.mrf.mxu0 }
 0x100   :  { %446 = vrot.lane.b32.xlu1 %v2895_v28, %s2771_s12  ;;  %296 = vrot.lane.b32.xlu0 %v2891_v23, %s2772_s13  ;;  %v2376_v38 = vpack.c.bf16 %v2909_v36, %v2907_v34 }
 0x102   :  { %2522 = vst [vmem:[#allocation2 + $0xc8] sm:$0xff] %v2376_v38  }
 0x104   :  { %298 = vrot.lane.b32.xlu1 %v2895_v28, %s2772_s13  ;;  %407 = vrot.lane.b32.xlu0 %v2891_v23, %s2773_s14 }
 0x108   :  { %409 = vrot.lane.b32.xlu1 %v2895_v28, %s2773_s14  ;;  %259 = vrot.lane.b32.xlu0 %v2891_v23, %s2774_s15 }
 0x10c   :  { %261 = vrot.lane.b32.xlu1 %v2895_v28, %s2774_s15  ;;  %370 = vrot.lane.b32.xlu0 %v2891_v23, %s2775_s16 }
 0x110   :  { %372 = vrot.lane.b32.xlu1 %v2895_v28, %s2775_s16  ;;  %222 = vrot.lane.b32.xlu0 %v2891_v23, %s2776_s17 }
 0x114   :  { %224 = vrot.lane.b32.xlu1 %v2895_v28, %s2776_s17  ;;  %760 = vrot.lane.b32.xlu0 %v2891_v23, %s2777_s18 }
 0x118   :  { %762 = vrot.lane.b32.xlu1 %v2895_v28, %s2777_s18  ;;  %629 = vrot.lane.b32.xlu0 %v2891_v23, %s2778_s19 }
 0x11c   :  { %631 = vrot.lane.b32.xlu1 %v2895_v28, %s2778_s19  ;;  %723 = vrot.lane.b32.xlu0 %v2891_v23, %s2779_s20 }
 0x120   :  { %725 = vrot.lane.b32.xlu1 %v2895_v28, %s2779_s20  ;;  %1056 = vrot.lane.b32.xlu0 %v2891_v23, %s2780_s21 }
 0x124   :  { %1058 = vrot.lane.b32.xlu1 %v2895_v28, %s2780_s21  ;;  %592 = vrot.lane.b32.xlu0 %v2891_v23, %s2781_s22 }
 0x128   :  { %594 = vrot.lane.b32.xlu1 %v2895_v28, %s2781_s22  ;;  %908 = vrot.lane.b32.xlu0 %v2891_v23, %s2782_s2 }
 0x12c   :  { %910 = vrot.lane.b32.xlu1 %v2895_v28, %s2782_s2  ;;  %686 = vrot.lane.b32.xlu0 %v2891_v23, %s2783_s23 }
 0x130   :  { %688 = vrot.lane.b32.xlu1 %v2895_v28, %s2783_s23  ;;  %1019 = vrot.lane.b32.xlu0 %v2891_v23, %s2784_s24 }
 0x134   :  { %1021 = vrot.lane.b32.xlu1 %v2895_v28, %s2784_s24  ;;  %555 = vrot.lane.b32.xlu0 %v2891_v23, %s2785_s25 }
 0x138   :  { %557 = vrot.lane.b32.xlu1 %v2895_v28, %s2785_s25  ;;  %871 = vrot.lane.b32.xlu0 %v2891_v23, %s2786_s26 }
 0x13c   :  { %873 = vrot.lane.b32.xlu1 %v2895_v28, %s2786_s26  ;;  %982 = vrot.lane.b32.xlu0 %v2891_v23, %s2787_s27 }
 0x140   :  { %984 = vrot.lane.b32.xlu1 %v2895_v28, %s2787_s27  ;;  %518 = vrot.lane.b32.xlu0 %v2891_v23, %s2788_s28 }
 0x144   :  { %520 = vrot.lane.b32.xlu1 %v2895_v28, %s2788_s28  ;;  %834 = vrot.lane.b32.xlu0 %v2891_v23, %s2789_s29 }
 0x148   :  { %836 = vrot.lane.b32.xlu1 %v2895_v28, %s2789_s29  ;;  %945 = vrot.lane.b32.xlu0 %v2891_v23, %s2790_s30 }
 0x14c   :  { %947 = vrot.lane.b32.xlu1 %v2895_v28, %s2790_s30  ;;  %485 = vrot.lane.b32.xlu0 %v2907_v34, %s2769_s0 }
 0x150   :  { %487 = vrot.lane.b32.xlu1 %v2909_v36, %s2769_s0  ;;  %337 = vrot.lane.b32.xlu0 %v2907_v34, %s2770_s1 }
 0x154   :  { %339 = vrot.lane.b32.xlu1 %v2909_v36, %s2770_s1  ;;  %448 = vrot.lane.b32.xlu0 %v2907_v34, %s2771_s12 }
 0x158   :  { %450 = vrot.lane.b32.xlu1 %v2909_v36, %s2771_s12  ;;  %300 = vrot.lane.b32.xlu0 %v2907_v34, %s2772_s13 }
 0x15c   :  { %302 = vrot.lane.b32.xlu1 %v2909_v36, %s2772_s13  ;;  %411 = vrot.lane.b32.xlu0 %v2907_v34, %s2773_s14 }
 0x160   :  { %413 = vrot.lane.b32.xlu1 %v2909_v36, %s2773_s14  ;;  %263 = vrot.lane.b32.xlu0 %v2907_v34, %s2774_s15 }
 0x164   :  { %265 = vrot.lane.b32.xlu1 %v2909_v36, %s2774_s15  ;;  %374 = vrot.lane.b32.xlu0 %v2907_v34, %s2775_s16 }
 0x166   :  { %v482_v39 = vpop.permute.xlu0 %481 }
 0x167   :  { %v494_v43 = vmul.f32 %v3020_v40, %v482_v39 }
 0x168   :  { %376 = vrot.lane.b32.xlu1 %v2909_v36, %s2775_s16  ;;  %226 = vrot.lane.b32.xlu0 %v2907_v34, %s2776_s17 }
 0x16a   :  { %v484_v41 = vpop.permute.xlu1 %483  ;;  %v334_v42 = vpop.permute.xlu0 %333 }
 0x16b   :  { %v495_v44 = vmul.f32 %v3020_v40, %v484_v41  ;;  %v346_v49 = vmul.f32 %v3031_v45, %v334_v42  ;;  %v3133_v41 = vld [vmem:[%s3389_s5 + $0xe] ss:$0 sm:$0xff] }
 0x16c   :  { %228 = vrot.lane.b32.xlu1 %v2909_v36, %s2776_s17  ;;  %764 = vrot.lane.b32.xlu0 %v2907_v34, %s2777_s18  ;;  %s2792_s17 = smov 110  }
 0x16d   :  { %v2321_v46 = vpack.c.bf16 %v495_v44, %v494_v43 }
 0x16e   :  { %v336_v47 = vpop.permute.xlu1 %335  ;;  %v445_v48 = vpop.permute.xlu0 %444 }
 0x16f   :  { %2511 = vst [vmem:[#allocation2 + $0x70] sm:$0xff] %v2321_v46   ;;  %v347_v50 = vmul.f32 %v3031_v45, %v336_v47  ;;  %v457_v56 = vmul.f32 %v3042_v51, %v445_v48  ;;  %v3144_v48 = vld [vmem:[%s3389_s5 + $0x17] ss:$0 sm:$0xff] }
 0x170   :  { %766 = vrot.lane.b32.xlu1 %v2909_v36, %s2777_s18  ;;  %633 = vrot.lane.b32.xlu0 %v2907_v34, %s2778_s19 }
 0x171   :  { %v2281_v52 = vpack.c.bf16 %v347_v50, %v346_v49 }
 0x172   :  { %v447_v54 = vpop.permute.xlu1 %446  ;;  %v297_v55 = vpop.permute.xlu0 %296 }
 0x173   :  { %2503 = vst [vmem:[#allocation2 + $0x30] sm:$0xff] %v2281_v52   ;;  %v458_v57 = vmul.f32 %v3042_v51, %v447_v54  ;;  %v309_v62 = vmul.f32 %v3056_v58, %v297_v55  ;;  %v3155_v55 = vld [vmem:[%s3389_s5 + $0xa] ss:$0 sm:$0xff] }
 0x174   :  { %635 = vrot.lane.b32.xlu1 %v2909_v36, %s2778_s19  ;;  %727 = vrot.lane.b32.xlu0 %v2907_v34, %s2779_s20 }
 0x175   :  { %v2311_v59 = vpack.c.bf16 %v458_v57, %v457_v56 }
 0x176   :  { %v299_v60 = vpop.permute.xlu1 %298  ;;  %v408_v61 = vpop.permute.xlu0 %407 }
 0x177   :  { %2509 = vst [vmem:[#allocation2 + $0x60] sm:$0xff] %v2311_v59   ;;  %v310_v63 = vmul.f32 %v3056_v58, %v299_v60  ;;  %v420_v4 = vmul.f32 %v3067_v0, %v408_v61 }
 0x178   :  { %729 = vrot.lane.b32.xlu1 %v2909_v36, %s2779_s20  ;;  %1060 = vrot.lane.b32.xlu0 %v2907_v34, %s2780_s21 }
 0x179   :  { %v2271_v1 = vpack.c.bf16 %v310_v63, %v309_v62  ;;  %v3166_v62 = vld [vmem:[%s3389_s5 + $0x13] ss:$0 sm:$0xff] }
 0x17a   :  { %v410_v2 = vpop.permute.xlu1 %409  ;;  %v260_v3 = vpop.permute.xlu0 %259 }
 0x17b   :  { %2501 = vst [vmem:[#allocation2 + $0x20] sm:$0xff] %v2271_v1   ;;  %v421_v5 = vmul.f32 %v3067_v0, %v410_v2  ;;  %v272_v10 = vmul.f32 %v3078_v6, %v260_v3 }
 0x17c   :  { %1062 = vrot.lane.b32.xlu1 %v2909_v36, %s2780_s21  ;;  %596 = vrot.lane.b32.xlu0 %v2907_v34, %s2781_s22 }
 0x17d   :  { %v2301_v7 = vpack.c.bf16 %v421_v5, %v420_v4  ;;  %v3177_v5 = vld [vmem:[%s3389_s5 + $0xd] ss:$0 sm:$0xff] }
 0x17e   :  { %v262_v8 = vpop.permute.xlu1 %261  ;;  %v371_v9 = vpop.permute.xlu0 %370 }
 0x17f   :  { %2507 = vst [vmem:[#allocation2 + $0x50] sm:$0xff] %v2301_v7   ;;  %v273_v11 = vmul.f32 %v3078_v6, %v262_v8  ;;  %v383_v16 = vmul.f32 %v3089_v12, %v371_v9 }
 0x180   :  { %598 = vrot.lane.b32.xlu1 %v2909_v36, %s2781_s22  ;;  %912 = vrot.lane.b32.xlu0 %v2907_v34, %s2782_s2 }
 0x181   :  { %v2261_v13 = vpack.c.bf16 %v273_v11, %v272_v10 }
 0x182   :  { %v373_v14 = vpop.permute.xlu1 %372  ;;  %v223_v15 = vpop.permute.xlu0 %222 }
 0x183   :  { %2499 = vst [vmem:[#allocation2 + $0x10] sm:$0xff] %v2261_v13   ;;  %v384_v17 = vmul.f32 %v3089_v12, %v373_v14  ;;  %v235_v22 = vmul.f32 %v3100_v18, %v223_v15  ;;  %v3188_v13 = vld [vmem:[%s3389_s5 + $0x16] ss:$0 sm:$0xff] }
 0x184   :  { %914 = vrot.lane.b32.xlu1 %v2909_v36, %s2782_s2  ;;  %690 = vrot.lane.b32.xlu0 %v2907_v34, %s2783_s23 }
 0x185   :  { %v2291_v19 = vpack.c.bf16 %v384_v17, %v383_v16 }
 0x186   :  { %v225_v20 = vpop.permute.xlu1 %224  ;;  %v761_v21 = vpop.permute.xlu0 %760 }
 0x187   :  { %2505 = vst [vmem:[#allocation2 + $0x40] sm:$0xff] %v2291_v19   ;;  %v236_v24 = vmul.f32 %v3100_v18, %v225_v20  ;;  %v773_v30 = vmul.f32 %v3111_v25, %v761_v21  ;;  %v3198_v20 = vld [vmem:[%s3389_s5 + $0x9] ss:$0 sm:$0xff] }
 0x188   :  { %692 = vrot.lane.b32.xlu1 %v2909_v36, %s2783_s23  ;;  %1023 = vrot.lane.b32.xlu0 %v2907_v34, %s2784_s24 }
 0x189   :  { %v2251_v26 = vpack.c.bf16 %v236_v24, %v235_v22 }
 0x18a   :  { %v763_v27 = vpop.permute.xlu1 %762  ;;  %v630_v29 = vpop.permute.xlu0 %629 }
 0x18b   :  { %2252 = vst [vmem:[#allocation2] sm:$0xff] %v2251_v26   ;;  %v774_v31 = vmul.f32 %v3111_v25, %v763_v27  ;;  %v642_v38 = vmul.f32 %v3122_v32, %v630_v29  ;;  %v3207_v29 = vld [vmem:[%s3389_s5 + $0x12] ss:$0 sm:$0xff] }
 0x18c   :  { %1025 = vrot.lane.b32.xlu1 %v2909_v36, %s2784_s24  ;;  %559 = vrot.lane.b32.xlu0 %v2907_v34, %s2785_s25 }
 0x18d   :  { %v2401_v33 = vpack.c.bf16 %v774_v31, %v773_v30  ;;  %v2749_v30 = vld [vmem:[%s3390_s3 + $0x14] ss:$28 sps:$4 sm:$0xff]  }
 0x18e   :  { %v632_v35 = vpop.permute.xlu1 %631  ;;  %v724_v37 = vpop.permute.xlu0 %723  ;;  %1754 = vmatprep.mubr.bf16.mxu0 %v2749_v30 }
 0x18f   :  { %2527 = vst [vmem:[#allocation2 + $0xf0] sm:$0xff] %v2401_v33   ;;  %v643_v39 = vmul.f32 %v3122_v32, %v632_v35  ;;  %v736_v46 = vmul.f32 %v3133_v41, %v724_v37 }
 0x190   :  { %561 = vrot.lane.b32.xlu1 %v2909_v36, %s2785_s25  ;;  %875 = vrot.lane.b32.xlu0 %v2907_v34, %s2786_s26 }
 0x191   :  { %v2361_v42 = vpack.c.bf16 %v643_v39, %v642_v38  ;;  %v3219_v39 = vld [vmem:[%s3389_s5 + $0x15] ss:$0 sm:$0xff] }
 0x192   :  { %v726_v43 = vpop.permute.xlu1 %725  ;;  %v1057_v44 = vpop.permute.xlu0 %1056 }
 0x193   :  { %2519 = vst [vmem:[#allocation2 + $0xb0] sm:$0xff] %v2361_v42   ;;  %v737_v47 = vmul.f32 %v3133_v41, %v726_v43  ;;  %v1069_v53 = vmul.f32 %v3144_v48, %v1057_v44  ;;  %v1242_v43 = vld [vmem:[%s3391_s4] sm:$0xff] }
 0x194   :  { %877 = vrot.lane.b32.xlu1 %v2909_v36, %s2786_s26  ;;  %986 = vrot.lane.b32.xlu0 %v2907_v34, %s2787_s27 }
 0x195   :  { %v2391_v49 = vpack.c.bf16 %v737_v47, %v736_v46 }
 0x196   :  { %v1059_v50 = vpop.permute.xlu1 %1058  ;;  %v593_v52 = vpop.permute.xlu0 %592 }
 0x197   :  { %2525 = vst [vmem:[#allocation2 + $0xe0] sm:$0xff] %v2391_v49   ;;  %v1070_v54 = vmul.f32 %v3144_v48, %v1059_v50  ;;  %v605_v60 = vmul.f32 %v3155_v55, %v593_v52  ;;  %v3231_v50 = vld [vmem:[%s3389_s5 + $0x8] ss:$0 sm:$0xff] }
 0x198   :  { %988 = vrot.lane.b32.xlu1 %v2909_v36, %s2787_s27  ;;  %522 = vrot.lane.b32.xlu0 %v2907_v34, %s2788_s28  ;;  %v1243_v52 = vld [vmem:[%s3391_s4 + $0x8] sm:$0xff] }
 0x199   :  { %v2481_v56 = vpack.c.bf16 %v1070_v54, %v1069_v53  ;;  %v1244_v53 = vld [vmem:[%s3391_s4 + $0x10] sm:$0xff] }
 0x19a   :  { %v595_v57 = vpop.permute.xlu1 %594  ;;  %v909_v59 = vpop.permute.xlu0 %908 }
 0x19b   :  { %2543 = vst [vmem:[#allocation2 + $0x170] sm:$0xff] %v2481_v56   ;;  %v606_v61 = vmul.f32 %v3155_v55, %v595_v57  ;;  %v921_v3 = vmul.f32 %v3166_v62, %v909_v59 }
 0x19c   :  { %524 = vrot.lane.b32.xlu1 %v2909_v36, %s2788_s28  ;;  %838 = vrot.lane.b32.xlu0 %v2907_v34, %s2789_s29 }
 0x19d   :  { %v2351_v63 = vpack.c.bf16 %v606_v61, %v605_v60  ;;  %v3245_v60 = vld [vmem:[%s3389_s5 + $0x11] ss:$0 sm:$0xff] }
 0x19e   :  { %v911_v1 = vpop.permute.xlu1 %910  ;;  %v687_v2 = vpop.permute.xlu0 %686 }
 0x19f   :  { %2517 = vst [vmem:[#allocation2 + $0xa0] sm:$0xff] %v2351_v63   ;;  %v922_v4 = vmul.f32 %v3166_v62, %v911_v1  ;;  %v699_v10 = vmul.f32 %v3177_v5, %v687_v2 }
 0x1a0   :  { %840 = vrot.lane.b32.xlu1 %v2909_v36, %s2789_s29  ;;  %949 = vrot.lane.b32.xlu0 %v2907_v34, %s2790_s30  ;;  %s2791_s29 = smov 121  }
 0x1a1   :  { %v2441_v7 = vpack.c.bf16 %v922_v4, %v921_v3  ;;  %v3252_v4 = vld [vmem:[%s3389_s5 + $0x14] ss:$0 sm:$0xff] }
 0x1a2   :  { %v689_v8 = vpop.permute.xlu1 %688  ;;  %v1020_v9 = vpop.permute.xlu0 %1019 }
 0x1a3   :  { %2535 = vst [vmem:[#allocation2 + $0x130] sm:$0xff] %v2441_v7   ;;  %v700_v11 = vmul.f32 %v3177_v5, %v689_v8  ;;  %v1032_v17 = vmul.f32 %v3188_v13, %v1020_v9 }
 0x1a4   :  { %951 = vrot.lane.b32.xlu1 %v2909_v36, %s2790_s30  ;;  %801 = vrot.lane.b32.xlu0 %v2907_v34, %s2791_s29 }
 0x1a5   :  { %v2381_v14 = vpack.c.bf16 %v700_v11, %v699_v10 }
 0x1a6   :  { %v1022_v15 = vpop.permute.xlu1 %1021  ;;  %v556_v16 = vpop.permute.xlu0 %555 }
 0x1a7   :  { %2523 = vst [vmem:[#allocation2 + $0xd0] sm:$0xff] %v2381_v14   ;;  %v1033_v19 = vmul.f32 %v3188_v13, %v1022_v15  ;;  %v568_v26 = vmul.f32 %v3198_v20, %v556_v16 }
 0x1a8   :  { %803 = vrot.lane.b32.xlu1 %v2909_v36, %s2791_s29  ;;  %797 = vrot.lane.b32.xlu0 %v2891_v23, %s2791_s29 }
 0x1a9   :  { %v2471_v21 = vpack.c.bf16 %v1033_v19, %v1032_v17 }
 0x1aa   :  { %v558_v22 = vpop.permute.xlu1 %557  ;;  %v872_v24 = vpop.permute.xlu0 %871 }
 0x1ab   :  { %2541 = vst [vmem:[#allocation2 + $0x160] sm:$0xff] %v2471_v21   ;;  %v569_v27 = vmul.f32 %v3198_v20, %v558_v22  ;;  %v884_v37 = vmul.f32 %v3207_v29, %v872_v24 }
 0x1ac   :  { %799 = vrot.lane.b32.xlu1 %v2895_v28, %s2791_s29  ;;  %1097 = vrot.lane.b32.xlu0 %v2907_v34, %s2792_s17 }
 0x1ad   :  { %v2341_v31 = vpack.c.bf16 %v569_v27, %v568_v26 }
 0x1ae   :  { %v874_v33 = vpop.permute.xlu1 %873  ;;  %v983_v35 = vpop.permute.xlu0 %982 }
 0x1af   :  { %2515 = vst [vmem:[#allocation2 + $0x90] sm:$0xff] %v2341_v31   ;;  %v885_v38 = vmul.f32 %v3207_v29, %v874_v33  ;;  %v995_v47 = vmul.f32 %v3219_v39, %v983_v35 }
 0x1b0   :  { %1099 = vrot.lane.b32.xlu1 %v2909_v36, %s2792_s17  ;;  %1093 = vrot.lane.b32.xlu0 %v2891_v23, %s2792_s17 }
 0x1b1   :  { %v2431_v42 = vpack.c.bf16 %v885_v38, %v884_v37 }
 0x1b2   :  { %v985_v44 = vpop.permute.xlu1 %984  ;;  %v519_v46 = vpop.permute.xlu0 %518 }
 0x1b3   :  { %2533 = vst [vmem:[#allocation2 + $0x120] sm:$0xff] %v2431_v42   ;;  %v996_v49 = vmul.f32 %v3219_v39, %v985_v44  ;;  %v531_v57 = vmul.f32 %v3231_v50, %v519_v46 }
 0x1b4   :  { %1095 = vrot.lane.b32.xlu1 %v2895_v28, %s2792_s17  ;;  %1247 = vperm.xlu0 %2669, %v1242_v43  }
 0x1b5   :  { %v2461_v36 = vpack.c.bf16 %v996_v49, %v995_v47 }
 0x1b6   :  { %v521_v54 = vpop.permute.xlu1 %520  ;;  %v835_v56 = vpop.permute.xlu0 %834 }
 0x1b7   :  { %2539 = vst [vmem:[#allocation2 + $0x150] sm:$0xff] %v2461_v36   ;;  %v532_v59 = vmul.f32 %v3231_v50, %v521_v54  ;;  %v847_v2 = vmul.f32 %v3245_v60, %v835_v56  ;;  %v2692_v56 = vld [vmem:[#allocation2 + $0x30] sm:$0xff]  }
 0x1b8   :  { %1252 = vperm.xlu1 %2670, %v1243_v52   ;;  %1257 = vperm.xlu0 %2669, %v1244_v53  }
 0x1b9   :  { %v2331_v61 = vpack.c.bf16 %v532_v59, %v531_v57 }
 0x1ba   :  { %v837_v63 = vpop.permute.xlu1 %836  ;;  %v946_v1 = vpop.permute.xlu0 %945 }
 0x1bb   :  { %2513 = vst [vmem:[#allocation2 + $0x80] sm:$0xff] %v2331_v61   ;;  %v848_v3 = vmul.f32 %v3245_v60, %v837_v63  ;;  %v958_v10 = vmul.f32 %v3252_v4, %v946_v1 }
 0x1bd   :  { %v2421_v7 = vpack.c.bf16 %v848_v3, %v847_v2 }
 0x1be   :  { %v948_v8 = vpop.permute.xlu1 %947  ;;  %v486_v9 = vpop.permute.xlu0 %485 }
 0x1bf   :  { %2531 = vst [vmem:[#allocation2 + $0x110] sm:$0xff] %v2421_v7   ;;  %v959_v11 = vmul.f32 %v3252_v4, %v948_v8  ;;  %v496_v17 = vmul.f32 %v3020_v40, %v486_v9  ;;  %v2695_v9 = vld [vmem:[#allocation2 + $0x60] sm:$0xff]  }
 0x1c1   :  { %v2451_v14 = vpack.c.bf16 %v959_v11, %v958_v10  ;;  %v2696_v11 = vld [vmem:[#allocation2 + $0x20] sm:$0xff]  }
 0x1c2   :  { %v488_v15 = vpop.permute.xlu1 %487  ;;  %v338_v16 = vpop.permute.xlu0 %337 }
 0x1c3   :  { %2537 = vst [vmem:[#allocation2 + $0x140] sm:$0xff] %v2451_v14   ;;  %v497_v19 = vmul.f32 %v3020_v40, %v488_v15  ;;  %v348_v26 = vmul.f32 %v3031_v45, %v338_v16 }
 0x1c5   :  { %v2326_v21 = vpack.c.bf16 %v497_v19, %v496_v17 }
 0x1c6   :  { %v340_v22 = vpop.permute.xlu1 %339  ;;  %v449_v24 = vpop.permute.xlu0 %448 }
 0x1c7   :  { %2512 = vst [vmem:[#allocation2 + $0x78] sm:$0xff] %v2326_v21   ;;  %v349_v27 = vmul.f32 %v3031_v45, %v340_v22  ;;  %v459_v35 = vmul.f32 %v3042_v51, %v449_v24 }
 0x1c9   :  { %v2286_v30 = vpack.c.bf16 %v349_v27, %v348_v26  ;;  %v2699_v27 = vld [vmem:[#allocation2 + $0x50] sm:$0xff]  }
 0x1ca   :  { %v451_v31 = vpop.permute.xlu1 %450  ;;  %v301_v33 = vpop.permute.xlu0 %300 }
 0x1cb   :  { %2504 = vst [vmem:[#allocation2 + $0x38] sm:$0xff] %v2286_v30   ;;  %v460_v37 = vmul.f32 %v3042_v51, %v451_v31  ;;  %v311_v44 = vmul.f32 %v3056_v58, %v301_v33  ;;  %v2691_v51 = vld [vmem:[#allocation2 + $0x70] sm:$0xff]  }
 0x1cc   :  { %v2700_v31 = vld [vmem:[#allocation2 + $0x10] sm:$0xff]  }
 0x1cd   :  { %v2316_v38 = vpack.c.bf16 %v460_v37, %v459_v35 }
 0x1ce   :  { %v303_v42 = vpop.permute.xlu1 %302  ;;  %v412_v43 = vpop.permute.xlu0 %411  ;;  %v2689_v40 = vld [vmem:[#allocation2 + $0x78] sm:$0xff]  }
 0x1cf   :  { %2510 = vst [vmem:[#allocation2 + $0x68] sm:$0xff] %v2316_v38   ;;  %v312_v46 = vmul.f32 %v3056_v58, %v303_v42  ;;  %2547 = vmatprep.subr.bf16.mxu1 %v2689_v40  ;;  %v422_v52 = vmul.f32 %v3067_v0, %v412_v43 }
 0x1d1   :  { %v2276_v47 = vpack.c.bf16 %v312_v46, %v311_v44 }
 0x1d2   :  { %v414_v45 = vpop.permute.xlu1 %413  ;;  %v264_v49 = vpop.permute.xlu0 %263  ;;  %v2690_v36 = vld [vmem:[#allocation2 + $0x38] sm:$0xff]  }
 0x1d3   :  { %2502 = vst [vmem:[#allocation2 + $0x28] sm:$0xff] %v2276_v47   ;;  %v423_v53 = vmul.f32 %v3067_v0, %v414_v45  ;;  %2548 = vmatpush3.bf16.msra.mxu1 %v2690_v36  ;;  %v274_v58 = vmul.f32 %v3078_v6, %v264_v49  ;;  %v2703_v47 = vld [vmem:[#allocation2 + $0x40] sm:$0xff]  }
 0x1d4   :  { %2549 = vmatprep.subr.bf16.mxu1 %v2691_v51  ;;  %v2704_v49 = vld [vmem:[#allocation2] sm:$0xff]  }
 0x1d5   :  { %v2306_v54 = vpack.c.bf16 %v423_v53, %v422_v52 }
 0x1d6   :  { %v266_v57 = vpop.permute.xlu1 %265  ;;  %v375_v59 = vpop.permute.xlu0 %374  ;;  %v2693_v61 = vld [vmem:[#allocation2 + $0x68] sm:$0xff]  }
 0x1d7   :  { %2508 = vst [vmem:[#allocation2 + $0x58] sm:$0xff] %v2306_v54   ;;  %v275_v63 = vmul.f32 %v3078_v6, %v266_v57  ;;  %2550 = vmatpush3.bf16.msra.mxu1 %v2692_v56  ;;  %v385_v0 = vmul.f32 %v3089_v12, %v375_v59 }
 0x1d8   :  { %2551 = vmatprep.subr.bf16.mxu1 %v2693_v61 }
 0x1d9   :  { %v2266_v1 = vpack.c.bf16 %v275_v63, %v274_v58 }
 0x1da   :  { %v377_v2 = vpop.permute.xlu1 %376  ;;  %v227_v3 = vpop.permute.xlu0 %226  ;;  %v2694_v7 = vld [vmem:[#allocation2 + $0x28] sm:$0xff]  }
 0x1db   :  { %2500 = vst [vmem:[#allocation2 + $0x18] sm:$0xff] %v2266_v1   ;;  %v386_v8 = vmul.f32 %v3089_v12, %v377_v2  ;;  %2552 = vmatpush3.bf16.msra.mxu1 %v2694_v7  ;;  %v237_v6 = vmul.f32 %v3100_v18, %v227_v3  ;;  %v2710_v2 = vld [vmem:[#allocation2 + $0xf0] sm:$0xff]  }
 0x1dc   :  { %2553 = vmatprep.subr.bf16.mxu1 %v2695_v9  ;;  %v2711_v3 = vld [vmem:[#allocation2 + $0xb0] sm:$0xff]  }
 0x1dd   :  { %v2296_v10 = vpack.c.bf16 %v386_v8, %v385_v0 }
 0x1de   :  { %v229_v14 = vpop.permute.xlu1 %228  ;;  %v765_v15 = vpop.permute.xlu0 %764  ;;  %v2697_v16 = vld [vmem:[#allocation2 + $0x58] sm:$0xff]  }
 0x1df   :  { %2506 = vst [vmem:[#allocation2 + $0x48] sm:$0xff] %v2296_v10   ;;  %v238_v17 = vmul.f32 %v3100_v18, %v229_v14  ;;  %2554 = vmatpush3.bf16.msra.mxu1 %v2696_v11  ;;  %v775_v12 = vmul.f32 %v3111_v25, %v765_v15 }
 0x1e0   :  { %2555 = vmatprep.subr.bf16.mxu1 %v2697_v16 }
 0x1e1   :  { %v2256_v19 = vpack.c.bf16 %v238_v17, %v237_v6 }
 0x1e2   :  { %v767_v21 = vpop.permute.xlu1 %766  ;;  %v634_v22 = vpop.permute.xlu0 %633  ;;  %v2698_v24 = vld [vmem:[#allocation2 + $0x18] sm:$0xff]  }
 0x1e3   :  { %2498 = vst [vmem:[#allocation2 + $0x8] sm:$0xff] %v2256_v19   ;;  %v776_v26 = vmul.f32 %v3111_v25, %v767_v21  ;;  %2556 = vmatpush3.bf16.msra.mxu1 %v2698_v24  ;;  %v644_v18 = vmul.f32 %v3122_v32, %v634_v22 }
 0x1e4   :  { %2557 = vmatprep.subr.bf16.mxu1 %v2699_v27  ;;  %v2717_v27 = vld [vmem:[#allocation2 + $0xe0] sm:$0xff]  }
 0x1e5   :  { %v2406_v30 = vpack.c.bf16 %v776_v26, %v775_v12 }
 0x1e6   :  { %v636_v33 = vpop.permute.xlu1 %635  ;;  %v728_v35 = vpop.permute.xlu0 %727  ;;  %v2701_v37 = vld [vmem:[#allocation2 + $0x48] sm:$0xff]  }
 0x1e7   :  { %2528 = vst [vmem:[#allocation2 + $0xf8] sm:$0xff] %v2406_v30   ;;  %v645_v38 = vmul.f32 %v3122_v32, %v636_v33  ;;  %2558 = vmatpush3.bf16.msra.mxu1 %v2700_v31  ;;  %v738_v25 = vmul.f32 %v3133_v41, %v728_v35  ;;  %v1138_v32 = vld [vmem:[%s3390_s3 + $0x38] sm:$0xff]  ;;  %v2718_v31 = vld [vmem:[#allocation2 + $0xa0] sm:$0xff]  }
 0x1e8   :  { %2559 = vmatprep.subr.bf16.mxu1 %v2701_v37  ;;  %v2075_v56 = vcombine.high %v1138_v32, %v1138_v32  ;;  %v2074_v11 = vcombine.low %v1138_v32, %v1138_v32 }
 0x1e9   :  { %v2366_v42 = vpack.c.bf16 %v645_v38, %v644_v18  ;;  %v2720_v38 = vld [vmem:[#allocation2 + $0x170] sm:$0xff]  }
 0x1ea   :  { %v730_v43 = vpop.permute.xlu1 %729  ;;  %v1061_v40 = vpop.permute.xlu0 %1060  ;;  %v2702_v44 = vld [vmem:[#allocation2 + $0x8] sm:$0xff]  }
 0x1eb   :  { %2520 = vst [vmem:[#allocation2 + $0xb8] sm:$0xff] %v2366_v42   ;;  %v739_v46 = vmul.f32 %v3133_v41, %v730_v43  ;;  %2560 = vmatpush3.bf16.msra.mxu1 %v2702_v44  ;;  %v1071_v51 = vmul.f32 %v3144_v48, %v1061_v40  ;;  %v2706_v41 = vld [vmem:[%s3390_s3] ss:$28 sps:$4 sm:$0xff]   ;;  %v2722_v43 = vld [vmem:[#allocation2 + $0x130] sm:$0xff]  }
 0x1ec   :  { %2561 = vmatprep.subr.bf16.mxu1 %v2703_v47 }
 0x1ed   :  { %v2396_v45 = vpack.c.bf16 %v739_v46, %v738_v25 }
 0x1ee   :  { %v1063_v36 = vpop.permute.xlu1 %1062  ;;  %v597_v52 = vpop.permute.xlu0 %596  ;;  %v2705_v53 = vld [vmem:[#allocation2 + $0xf8] sm:$0xff]  }
 0x1ef   :  { %2526 = vst [vmem:[#allocation2 + $0xe8] sm:$0xff] %v2396_v45   ;;  %v1072_v54 = vmul.f32 %v3144_v48, %v1063_v36  ;;  %2562 = vmatpush3.bf16.msra.mxu1 %v2704_v49  ;;  %v607_v63 = vmul.f32 %v3155_v55, %v597_v52 }
 0x1f0   :  { %2575 = vmatprep.subr.bf16.mxu1 %v2705_v53 }
 0x1f1   :  { %v2486_v57 = vpack.c.bf16 %v1072_v54, %v1071_v51 }
 0x1f2   :  { %v599_v59 = vpop.permute.xlu1 %598  ;;  %v913_v61 = vpop.permute.xlu0 %912  ;;  %v2709_v58 = vld [vmem:[#allocation2 + $0xb8] sm:$0xff]   ;;  %1659 = vmatmul.mubr.bf16.vlgmr.msra.gmra.mxu1 %v2706_v41 }
 0x1f3   :  { %2544 = vst [vmem:[#allocation2 + $0x178] sm:$0xff] %v2486_v57   ;;  %v608_v1 = vmul.f32 %v3155_v55, %v599_v59  ;;  %2576 = vmatpush3.bf16.msra.mxu1 %v2709_v58  ;;  %1666 = vmatprep.mubr.bf16.mxu1 %v2075_v56  ;;  %v923_v9 = vmul.f32 %v3166_v62, %v913_v61  ;;  %v2739_v55 = vld [vmem:[%s3390_s3 + $0xc] ss:$28 sps:$4 sm:$0xff]   ;;  %v2725_v56 = vld [vmem:[#allocation2 + $0xd0] sm:$0xff]  }
 0x1f4   :  { %2577 = vmatprep.subr.bf16.mxu1 %v2710_v2  ;;  %v2726_v59 = vld [vmem:[#allocation2 + $0x90] sm:$0xff]   ;;  %v2728_v2 = vld [vmem:[#allocation2 + $0xc8] sm:$0xff]  }
 0x1f5   :  { %v2356_v48 = vpack.c.bf16 %v608_v1, %v607_v63 }
 0x1f6   :  { %v915_v7 = vpop.permute.xlu1 %914  ;;  %v691_v0 = vpop.permute.xlu0 %690  ;;  %v2712_v8 = vld [vmem:[#allocation2 + $0xe8] sm:$0xff]  }
 0x1f7   :  { %2518 = vst [vmem:[#allocation2 + $0xa8] sm:$0xff] %v2356_v48   ;;  %v924_v10 = vmul.f32 %v3166_v62, %v915_v7  ;;  %2578 = vmatpush3.bf16.msra.mxu1 %v2711_v3  ;;  %v701_v17 = vmul.f32 %v3177_v5, %v691_v0  ;;  %v2729_v48 = vld [vmem:[#allocation2 + $0x160] sm:$0xff]  }
 0x1f8   :  { %2579 = vmatprep.subr.bf16.mxu1 %v2712_v8 }
 0x1f9   :  { %v2446_v14 = vpack.c.bf16 %v924_v10, %v923_v9 }
 0x1fa   :  { %v693_v15 = vpop.permute.xlu1 %692  ;;  %v1024_v16 = vpop.permute.xlu0 %1023  ;;  %v2715_v6 = vld [vmem:[#allocation2 + $0x178] sm:$0xff]   ;;  %1667 = vmatmul.mubr.bf16.gmra.mxu1 %v2074_v11 }
 0x1fb   :  { %2536 = vst [vmem:[#allocation2 + $0x138] sm:$0xff] %v2446_v14   ;;  %v702_v19 = vmul.f32 %v3177_v5, %v693_v15  ;;  %2603 = vmatprep.subr.bf16.mxu0 %v2715_v6  ;;  %1706 = vmatprep.mubr.bf16.mxu1 %v2739_v55  ;;  %v1034_v12 = vmul.f32 %v3188_v13, %v1024_v16 }
 0x1fd   :  { %v2386_v62 = vpack.c.bf16 %v702_v19, %v701_v17  ;;  %v2733_v17 = vld [vmem:[#allocation2 + $0xc0] sm:$0xff]  }
 0x1fe   :  { %v1026_v21 = vpop.permute.xlu1 %1025  ;;  %v560_v22 = vpop.permute.xlu0 %559  ;;  %v2716_v24 = vld [vmem:[#allocation2 + $0xa8] sm:$0xff]  }
 0x1ff   :  { %2524 = vst [vmem:[#allocation2 + $0xd8] sm:$0xff] %v2386_v62   ;;  %v1035_v26 = vmul.f32 %v3188_v13, %v1026_v21  ;;  %2580 = vmatpush3.bf16.msra.mxu1 %v2716_v24  ;;  %v570_v37 = vmul.f32 %v3198_v20, %v560_v22  ;;  %v2734_v62 = vld [vmem:[#allocation2 + $0x80] sm:$0xff]  }
 0x200   :  { %2581 = vmatprep.subr.bf16.mxu1 %v2717_v27  ;;  %v2736_v27 = vld [vmem:[#allocation2 + $0x150] sm:$0xff]  }
 0x201   :  { %v2476_v30 = vpack.c.bf16 %v1035_v26, %v1034_v12 }
 0x202   :  { %v562_v33 = vpop.permute.xlu1 %561  ;;  %v876_v35 = vpop.permute.xlu0 %875  ;;  %v2719_v5 = vld [vmem:[#allocation2 + $0x138] sm:$0xff]  }
 0x203   :  { %2542 = vst [vmem:[#allocation2 + $0x168] sm:$0xff] %v2476_v30   ;;  %v571_v18 = vmul.f32 %v3198_v20, %v562_v33  ;;  %2582 = vmatpush3.bf16.msra.mxu1 %v2718_v31  ;;  %2604 = vmatpush3.bf16.msra.mxu0 %v2719_v5  ;;  %v886_v25 = vmul.f32 %v3207_v29, %v876_v35  ;;  %v2737_v30 = vld [vmem:[%s3390_s3 + $0x8] ss:$28 sps:$4 sm:$0xff]   ;;  %v2062_v31 = vld [vmem:[%s3389_s5 + $0x18] ss:$0 sm:$0xff]  ;;  %v2740_v5 = vld [vmem:[#allocation2 + $0x110] sm:$0xff]  }
 0x204   :  { %2605 = vmatprep.subr.bf16.mxu0 %v2720_v38 }
 0x205   :  { %v2346_v42 = vpack.c.bf16 %v571_v18, %v570_v37 }
 0x206   :  { %v878_v13 = vpop.permute.xlu1 %877  ;;  %v987_v40 = vpop.permute.xlu0 %986  ;;  %v2721_v44 = vld [vmem:[#allocation2 + $0xd8] sm:$0xff]  }
 0x207   :  { %2516 = vst [vmem:[#allocation2 + $0x98] sm:$0xff] %v2346_v42   ;;  %v887_v46 = vmul.f32 %v3207_v29, %v878_v13  ;;  %2583 = vmatprep.subr.bf16.mxu1 %v2721_v44  ;;  %2606 = vmatpush3.bf16.msra.mxu0 %v2722_v43  ;;  %v997_v32 = vmul.f32 %v3219_v39, %v987_v40 }
 0x209   :  { %v2436_v47 = vpack.c.bf16 %v887_v46, %v886_v25 }
 0x20a   :  { %v989_v45 = vpop.permute.xlu1 %988  ;;  %v523_v49 = vpop.permute.xlu0 %522  ;;  %v2723_v20 = vld [vmem:[#allocation2 + $0x168] sm:$0xff]  }
 0x20b   :  { %2534 = vst [vmem:[#allocation2 + $0x128] sm:$0xff] %v2436_v47   ;;  %v998_v36 = vmul.f32 %v3219_v39, %v989_v45  ;;  %2607 = vmatprep.subr.bf16.mxu0 %v2723_v20  ;;  %v533_v41 = vmul.f32 %v3231_v50, %v523_v49  ;;  %v2743_v47 = vld [vmem:[#allocation2 + $0x140] sm:$0xff]   ;;  %v2754_v49 = vld [vmem:[%s3390_s3 + $0x18] ss:$28 sps:$4 sm:$0xff]  }
 0x20d   :  { %v2466_v52 = vpack.c.bf16 %v998_v36, %v997_v32  ;;  %v1140_v32 = vld [vmem:[%s3390_s3 + $0x48] sm:$0xff] }
 0x20e   :  { %v525_v53 = vpop.permute.xlu1 %524  ;;  %v839_v51 = vpop.permute.xlu0 %838  ;;  %v2724_v54 = vld [vmem:[#allocation2 + $0x98] sm:$0xff]  }
 0x20f   :  { %2540 = vst [vmem:[#allocation2 + $0x158] sm:$0xff] %v2466_v52   ;;  %v534_v29 = vmul.f32 %v3231_v50, %v525_v53  ;;  %2584 = vmatpush3.bf16.msra.mxu1 %v2724_v54  ;;  %v849_v39 = vmul.f32 %v3245_v60, %v839_v51  ;;  %v2730_v50 = vld [vmem:[#allocation2 + $0x120] sm:$0xff]   ;;  %v2747_v52 = vld [vmem:[%s3390_s3 + $0x10] ss:$28 sps:$4 sm:$0xff]   ;;  %v2079_v53 = vcombine.high %v1140_v32, %v1140_v32 }
 0x210   :  { %2585 = vmatprep.subr.bf16.mxu1 %v2725_v56 }
 0x211   :  { %v2336_v57 = vpack.c.bf16 %v534_v29, %v533_v41  ;;  %v2078_v41 = vcombine.low %v1140_v32, %v1140_v32  ;;  %v2755_v29 = vld [vmem:[%s3390_s3 + $0x50] ss:$0 sps:$4 sm:$0xff]  }
 0x212   :  { %v841_v61 = vpop.permute.xlu1 %840  ;;  %v950_v58 = vpop.permute.xlu0 %949  ;;  %v2727_v63 = vld [vmem:[#allocation2 + $0x128] sm:$0xff]  }
 0x213   :  { %2514 = vst [vmem:[#allocation2 + $0x88] sm:$0xff] %v2336_v57   ;;  %v850_v1 = vmul.f32 %v3245_v60, %v841_v61  ;;  %2586 = vmatpush3.bf16.msra.mxu1 %v2726_v59  ;;  %2608 = vmatpush3.bf16.msra.mxu0 %v2727_v63  ;;  %v960_v9 = vmul.f32 %v3252_v4, %v950_v58  ;;  %v2022_v60 = vld [vmem:[%s3389_s5 + $0x10] ss:$0 sm:$0xff] }
 0x214   :  { %2587 = vmatprep.subr.bf16.mxu1 %v2728_v2  ;;  %2609 = vmatprep.subr.bf16.mxu0 %v2729_v48 }
 0x215   :  { %v2426_v3 = vpack.c.bf16 %v850_v1, %v849_v39 }
 0x216   :  { %v952_v7 = vpop.permute.xlu1 %951  ;;  %v802_v0 = vpop.permute.xlu0 %801  ;;  %v2731_v8 = vld [vmem:[#allocation2 + $0x158] sm:$0xff]  }
 0x217   :  { %2532 = vst [vmem:[#allocation2 + $0x118] sm:$0xff] %v2426_v3   ;;  %v961_v10 = vmul.f32 %v3252_v4, %v952_v7  ;;  %2610 = vmatpush3.bf16.msra.mxu0 %v2730_v50  ;;  %v812_v16 = vmul.f32 %v2022_v60, %v802_v0  ;;  %v1139_v4 = vld [vmem:[%s3390_s3 + $0x40] sm:$0xff]  ;;  %s2793_s3 = smov 64  }
 0x218   :  { %2611 = vmatprep.subr.bf16.mxu0 %v2731_v8  ;;  %v2077_v33 = vcombine.high %v1139_v4, %v1139_v4  ;;  %v2076_v45 = vcombine.low %v1139_v4, %v1139_v4 }
 0x219   :  { %v2456_v11 = vpack.c.bf16 %v961_v10, %v960_v9 }
 0x21a   :  { %v804_v55 = vpop.permute.xlu1 %803  ;;  %v798_v14 = vpop.permute.xlu0 %797  ;;  %v2732_v15 = vld [vmem:[#allocation2 + $0x88] sm:$0xff]  }
 0x21b   :  { %2538 = vst [vmem:[#allocation2 + $0x148] sm:$0xff] %v2456_v11   ;;  %v813_v6 = vmul.f32 %v2022_v60, %v804_v55  ;;  %2588 = vmatpush3.bf16.msra.mxu1 %v2732_v15  ;;  %v810_v12 = vmul.f32 %v2022_v60, %v798_v14 }
 0x21c   :  { %2589 = vmatprep.subr.bf16.mxu1 %v2733_v17 }
 0x21d   :  { %v2416_v19 = vpack.c.bf16 %v813_v6, %v812_v16 }
 0x21e   :  { %v800_v21 = vpop.permute.xlu1 %799  ;;  %v1098_v22 = vpop.permute.xlu0 %1097  ;;  %v2735_v24 = vld [vmem:[#allocation2 + $0x118] sm:$0xff]  }
 0x21f   :  { %2530 = vst [vmem:[#allocation2 + $0x108] sm:$0xff] %v2416_v19   ;;  %v811_v26 = vmul.f32 %v2022_v60, %v800_v21  ;;  %2590 = vmatpush3.bf16.msra.mxu1 %v2734_v62  ;;  %2612 = vmatpush3.bf16.msra.mxu0 %v2735_v24  ;;  %v1108_v38 = vmul.f32 %v2062_v31, %v1098_v22 }
 0x220   :  { %2613 = vmatprep.subr.bf16.mxu0 %v2736_v27 }
 0x221   :  { %v2411_v35 = vpack.c.bf16 %v811_v26, %v810_v12 }
 0x222   :  { %v1100_v37 = vpop.permute.xlu1 %1099  ;;  %v2741_v18 = vld [vmem:[#allocation2 + $0x148] sm:$0xff]   ;;  %1707 = vmatmul.mubr.bf16.vlgmr.msra.gmra.mxu1 %v2737_v30  ;;  %v1094_v43 = vpop.permute.xlu0 %1093 }
 0x223   :  { %2529 = vst [vmem:[#allocation2 + $0x100] sm:$0xff] %v2411_v35   ;;  %v1109_v42 = vmul.f32 %v2062_v31, %v1100_v37  ;;  %2614 = vmatpush3.bf16.msra.mxu0 %v2740_v5  ;;  %1714 = vmatprep.mubr.bf16.mxu1 %v2077_v33  ;;  %v1106_v25 = vmul.f32 %v2062_v31, %v1094_v43 }
 0x224   :  { %2615 = vmatprep.subr.bf16.mxu0 %v2741_v18 }
 0x225   :  { %v2496_v13 = vpack.c.bf16 %v1109_v42, %v1108_v38 }
 0x226   :  { %v1096_v40 = vpop.permute.xlu1 %1095  ;;  %v2742_v44 = vld [vmem:[#allocation2 + $0x108] sm:$0xff]  }
 0x227   :  { %2546 = vst [vmem:[#allocation2 + $0x188] sm:$0xff] %v2496_v13   ;;  %v1107_v46 = vmul.f32 %v2062_v31, %v1096_v40  ;;  %2616 = vmatpush3.bf16.msra.mxu0 %v2742_v44  ;;  %v2133_v13 = vadd.f32 -0.5, %v2891_v23 }
 0x228   :  { %2617 = vmatprep.subr.bf16.mxu0 %v2743_v47 }
 0x229   :  { %v2491_v20 = vpack.c.bf16 %v1107_v46, %v1106_v25 }
 0x22a   :  { %v2746_v36 = vld [vmem:[#allocation2 + $0x100] sm:$0xff]   ;;  %1715 = vmatmul.mubr.bf16.gmra.mxu1 %v2076_v45 }
 0x22b   :  { %2545 = vst [vmem:[#allocation2 + $0x180] sm:$0xff] %v2491_v20   ;;  %2618 = vmatpush3.bf16.msra.mxu0 %v2746_v36  ;;  %2639 = vmatprep.mubr.msk.bf16.mxu1 %vm1619_vm1, %v2754_v49  ;;  %v2135_v20 = vadd.f32 -0.5, %v2907_v34 }
 0x22e   :  { %v2750_v51 = vld [vmem:[#allocation2 + $0x188] sm:$0xff]   ;;  %1755 = vmatmul.mubr.bf16.vlgmr.msra.gmra.mxu0 %v2747_v52 }
 0x22f   :  { %2635 = vmatprep.subr.bf16.mxu1 %v2750_v51  ;;  %1762 = vmatprep.mubr.bf16.mxu0 %v2079_v53  ;;  %v1248_v10 = vpop.permute.xlu0 %1247  ;;  %v2134_v53 = vadd.f32 -0.5, %v2895_v28 }
 0x230   :  { %2636 = vmatpush3.bf16.msra.mxu1 %v2750_v51 }
 0x232   :  { %v2751_v54 = vld [vmem:[#allocation2 + $0x180] sm:$0xff]  }
 0x233   :  { %2637 = vmatprep.subr.bf16.mxu1 %v2751_v54  ;;  %v1258_v21 = vpop.permute.xlu0 %1257  ;;  %v1253_v26 = vpop.permute.xlu1 %1252 }
 0x234   :  { %2638 = vmatpush3.bf16.msra.mxu1 %v2751_v54 }
 0x236   :  { %1763 = vmatmul.mubr.bf16.gmra.mxu0 %v2078_v41 }
 0x237   :  { %2640 = vmatmul.mubr.msk.bf16.vlgmr.msra.gmra.mxu1 %vm1619_vm1, %v2755_v29 }
 0x2b2   :  { %v2563_v56 = vpop.f32.mrf.mxu1 }
 0x2b4   :  { %v2564_v57 = vpop.f32.mrf.mxu1 }
 0x2b5   :  { %v2565_v60 = vadd.f32 %v2564_v57, %v2563_v56 }
 0x2b6   :  { %v2566_v59 = vpop.f32.mrf.mxu1 }
 0x2b7   :  { %v1661_v6 = vadd.f32 %v2565_v60, %v1248_v10 }
 0x2b8   :  { %v2567_v61 = vpop.f32.mrf.mxu1 }
 0x2b9   :  { %v2568_v17 = vadd.f32 %v2567_v61, %v2566_v59 }
 0x2ba   :  { %v2569_v58 = vpop.f32.mrf.mxu1 }
 0x2bb   :  { %v1664_v31 = vadd.f32 %v2568_v17, %v1253_v26 }
 0x2bc   :  { %v2570_v63 = vpop.f32.mrf.mxu1 }
 0x2bd   :  { %v2571_v16 = vadd.f32 %v2570_v63, %v2569_v58 }
 0x2be   :  { %v2572_v39 = vpop.f32.mrf.mxu1 }
 0x2bf   :  { %v1669_v27 = vadd.f32 %v2571_v16, %v1258_v21 }
 0x2c0   :  { %v2573_v1 = vpop.f32.mrf.mxu1 }
 0x2e2   :  { %v2591_v2 = vpop.f32.mrf.mxu1 }
 0x2e4   :  { %v2592_v48 = vpop.f32.mrf.mxu1 }
 0x2e5   :  { %v2593_v14 = vadd.f32 %v2592_v48, %v2591_v2 }
 0x2e6   :  { %v2594_v3 = vpop.f32.mrf.mxu1 }
 0x2e7   :  { %v1709_v22 = vadd.f32 %v2593_v14, %v1661_v6 }
 0x2e8   :  { %v2595_v50 = vpop.f32.mrf.mxu1 }
 0x2e9   :  { %v2596_v24 = vadd.f32 %v2595_v50, %v2594_v3 }
 0x2ea   :  { %v2597_v7 = vpop.f32.mrf.mxu1 }
 0x2eb   :  { %v1712_v42 = vadd.f32 %v2596_v24, %v1664_v31 }
 0x2ec   :  { %v2598_v0 = vpop.f32.mrf.mxu1 }
 0x2ed   :  { %v2599_v4 = vadd.f32 %v2598_v0, %v2597_v7 }
 0x2ee   :  { %v2619_v8 = vpop.f32.mrf.mxu0  ;;  %v2600_v9 = vpop.f32.mrf.mxu1 }
 0x2ef   :  { %v1717_v37 = vadd.f32 %v2599_v4, %v1669_v27 }
 0x2f0   :  { %v2620_v11 = vpop.f32.mrf.mxu0  ;;  %v2601_v55 = vpop.f32.mrf.mxu1 }
 0x2f1   :  { %v2621_v19 = vadd.f32 %v2620_v11, %v2619_v8 }
 0x2f2   :  { %v2622_v15 = vpop.f32.mrf.mxu0 }
 0x2f3   :  { %v1757_v5 = vadd.f32 %v2621_v19, %v1709_v22 }
 0x2f4   :  { %v2623_v62 = vpop.f32.mrf.mxu0 }
 0x2f5   :  { %v2624_v33 = vadd.f32 %v2623_v62, %v2622_v15 }
 0x2f6   :  { %v2625_v12 = vpop.f32.mrf.mxu0 }
 0x2f7   :  { %v2641_v30 = vpop.f32.mrf.mxu1  ;;  %v1760_v47 = vadd.f32 %v2624_v33, %v1712_v42 }
 0x2f8   :  { %v2626_v35 = vpop.f32.mrf.mxu0 }
 0x2f9   :  { %v2627_v18 = vadd.f32 %v2626_v35, %v2625_v12  ;;  %v1804_v38 = vpop.f32.mrf.mxu1 }
 0x2fa   :  { %v1805_v43 = vadd.f32 %v1804_v38, %v1757_v5  ;;  %v2628_v40 = vpop.f32.mrf.mxu0 }
 0x2fb   :  { %v1765_v44 = vadd.f32 %v2627_v18, %v1717_v37  ;;  %v2642_v25 = vpop.f32.mrf.mxu1 }
 0x2fc   :  { %v3336_v46 = vsub.f32 %v1805_v43, %v2133_v13  ;;  %v2629_v45 = vpop.f32.mrf.mxu0 }
 0x2fd   :  { %v1813_v49 = vadd.f32 %v2641_v30, %v1765_v44  ;;  %v1807_v32 = vpop.f32.mrf.mxu1 }
 0x2fe   :  { %v3340_v36 = vmul.f32 0.70710677, %v3336_v46  ;;  %v1808_v52 = vadd.f32 %v1807_v32, %v1760_v47 }
 0x2ff   :  { %v3343_v51 = vsub.f32 %v1813_v49, %v2135_v20  ;;  %v1896_v20 = vmul.f32 0.5, %v3336_v46 }
 0x300   :  { %v1827_v23 = vand.u32 2147483647, %v3340_v36  ;;  %v3346_v54 = vsub.f32 %v1808_v52, %v2134_v53  ;;  %vm1884_vm2 = vcmp.ge.f32.partialorder %v3340_v36, 0.0 }
 0x301   :  { %v3349_v41 = vmul.f32 0.70710677, %v3343_v51 }
 0x302   :  { %v1830_v29 = vmul.f32 0.3275911, %v1827_v23  ;;  %v3352_v56 = vmul.f32 0.70710677, %v3346_v54  ;;  %v1869_v39 = vsub.f32 0.0, %v1827_v23 }
 0x303   :  { %v1829_v34 = vand.u32 2147483647, %v3349_v41  ;;  %vm1886_vm3 = vcmp.ge.f32.partialorder %v3349_v41, 0.0 }
 0x304   :  { %v1833_v57 = vadd.f32 1.0, %v1830_v29  ;;  %v1828_v59 = vand.u32 2147483647, %v3352_v56  ;;  %v1872_v2 = vmul.f32 %v1869_v39, %v1827_v23  ;;  %vm1885_vm4 = vcmp.ge.f32.partialorder %v3352_v56, 0.0 }
 0x305   :  { %v1832_v61 = vmul.f32 0.3275911, %v1829_v34  ;;  %v1871_v1 = vsub.f32 0.0, %v1829_v34 }
 0x306   :  { %2756 = vrcp.f32 %v1833_v57  ;;  %v1831_v28 = vmul.f32 0.3275911, %v1828_v59  ;;  %v1870_v48 = vsub.f32 0.0, %v1828_v59  ;;  %v1875_v0 = vmul.f32 1.442695, %v1872_v2 }
 0x307   :  { %v1835_v58 = vadd.f32 1.0, %v1832_v61  ;;  %v1874_v50 = vmul.f32 %v1871_v1, %v1829_v34  ;;  %v1898_v57 = vmul.f32 0.5, %v3343_v51 }
 0x308   :  { %v1834_v63 = vadd.f32 1.0, %v1831_v28  ;;  %v1873_v8 = vmul.f32 %v1870_v48, %v1828_v59  ;;  %v1897_v28 = vmul.f32 0.5, %v3346_v54 }
 0x309   :  { %2758 = vrcp.f32 %v1835_v58  ;;  %v1879_v11 = vmul.f32 1.442695, %v1874_v50 }
 0x30a   :  { %2760 = vrcp.f32 %v1834_v63  ;;  %v1877_v16 = vmul.f32 1.442695, %v1873_v8 }
 0x30b   :  { %2762 = vpow2.f32 %v1875_v0 }
 0x30c   :  { %2764 = vpow2.f32 %v1879_v11 }
 0x30d   :  { %2766 = vpow2.f32 %v1877_v16 }
 0x313   :  { %v2757_v3 = vpop.eup %2756 }
 0x314   :  { %v1842_v7 = vmul.f32 1.0614054, %v2757_v3 }
 0x316   :  { %v2759_v9 = vpop.eup %2758  ;;  %v2136_v10 = vadd.f32 -1.4531521, %v1842_v7 }
 0x317   :  { %v2761_v60 = vpop.eup %2760  ;;  %v1844_v55 = vmul.f32 1.0614054, %v2759_v9 }
 0x318   :  { %v1848_v14 = vmul.f32 %v2757_v3, %v2136_v10  ;;  %v1843_v15 = vmul.f32 1.0614054, %v2761_v60  ;;  %v2763_v38 = vpop.eup %2762 }
 0x319   :  { %v2138_v6 = vadd.f32 -1.4531521, %v1844_v55  ;;  %v2765_v44 = vpop.eup %2764 }
 0x31a   :  { %v1851_v17 = vadd.f32 1.4214138, %v1848_v14  ;;  %v2137_v19 = vadd.f32 -1.4531521, %v1843_v15  ;;  %v2767_v49 = vpop.eup %2766 }
 0x31b   :  { %v1850_v62 = vmul.f32 %v2759_v9, %v2138_v6 }
 0x31c   :  { %v1854_v4 = vmul.f32 %v2757_v3, %v1851_v17  ;;  %v1849_v21 = vmul.f32 %v2761_v60, %v2137_v19 }
 0x31d   :  { %v1853_v22 = vadd.f32 1.4214138, %v1850_v62 }
 0x31e   :  { %v2139_v24 = vadd.f32 -0.28449672, %v1854_v4  ;;  %v1852_v12 = vadd.f32 1.4214138, %v1849_v21 }
 0x31f   :  { %v1856_v26 = vmul.f32 %v2759_v9, %v1853_v22 }
 0x320   :  { %v1860_v27 = vmul.f32 %v2757_v3, %v2139_v24  ;;  %v1855_v30 = vmul.f32 %v2761_v60, %v1852_v12 }
 0x321   :  { %v2141_v31 = vadd.f32 -0.28449672, %v1856_v26 }
 0x322   :  { %v1863_v33 = vadd.f32 0.2548296, %v1860_v27  ;;  %v2140_v35 = vadd.f32 -0.28449672, %v1855_v30 }
 0x323   :  { %v1862_v5 = vmul.f32 %v2759_v9, %v2141_v31 }
 0x324   :  { %v1866_v37 = vmul.f32 %v2757_v3, %v1863_v33  ;;  %v1861_v18 = vmul.f32 %v2761_v60, %v2140_v35 }
 0x325   :  { %v1865_v42 = vadd.f32 0.2548296, %v1862_v5 }
 0x326   :  { %v1881_v43 = vmul.f32 %v2763_v38, %v1866_v37  ;;  %v1864_v13 = vadd.f32 0.2548296, %v1861_v18 }
 0x327   :  { %v1868_v40 = vmul.f32 %v2759_v9, %v1865_v42 }
 0x328   :  { %v1887_v25 = vsub.f32 0.0, %v1881_v43  ;;  %v2142_v47 = vadd.f32 -2.0, %v1881_v43  ;;  %v1867_v45 = vmul.f32 %v2761_v60, %v1864_v13 }
 0x329   :  { %v1883_v32 = vmul.f32 %v2765_v44, %v1868_v40 }
 0x32a   :  { %v1893_v52 = vsel %vm1884_vm2, %v1887_v25, %v2142_v47  ;;  %v1882_v53 = vmul.f32 %v2767_v49, %v1867_v45 }
 0x32b   :  { %v1899_v23 = vmul.f32 %v1896_v20, %v1893_v52  ;;  %v1889_v29 = vsub.f32 0.0, %v1883_v32  ;;  %v2144_v34 = vadd.f32 -2.0, %v1883_v32 }
 0x32c   :  { %v1888_v59 = vsub.f32 0.0, %v1882_v53  ;;  %v2143_v61 = vadd.f32 -2.0, %v1882_v53 }
 0x32d   :  { %1908 = vrot.lane.b32.xlu1 %v1899_v23, %s2793_s3  ;;  %v1895_v36 = vsel %vm1886_vm3, %v1889_v29, %v2144_v34  ;;  %1902 = vst.msk [vmem:[%s3392_s6] sm:$0xff] %vm166_vm0, %v1899_v23 }
 0x32e   :  { %v1894_v46 = vsel %vm1885_vm4, %v1888_v59, %v2143_v61  ;;  %v1901_v58 = vmul.f32 %v1898_v57, %v1895_v36 }
 0x32f   :  { %v1900_v63 = vmul.f32 %v1897_v28, %v1894_v46 }
 0x330   :  { %1904 = vst.msk [vmem:[%s3392_s6 + $0x10] sm:$0xff] %vm166_vm0, %v1901_v58 }
 0x331   :  { %1910 = vrot.lane.b32.xlu0 %v1900_v63, %s2793_s3  ;;  %1912 = vrot.lane.b32.xlu1 %v1901_v58, %s2793_s3  ;;  %1903 = vst.msk [vmem:[%s3392_s6 + $0x8] sm:$0xff] %vm166_vm0, %v1900_v63 }
 0x39f   :  { %v1909_v51 = vpop.permute.xlu1 %1908 }
 0x3a0   :  { %2145 = vst.msk [vmem:[%s3392_s6 + $0x18] sm:$0xff] %vm166_vm0, %v1909_v51 }
 0x3a3   :  { %v1911_v54 = vpop.permute.xlu0 %1910  ;;  %v1913_v41 = vpop.permute.xlu1 %1912 }
 0x3a4   :  { %2146 = vst.msk [vmem:[%s3392_s6 + $0x20] sm:$0xff] %vm166_vm0, %v1911_v54  ;;  %2147 = vst.msk [vmem:[%s3392_s6 + $0x28] sm:$0xff] %vm166_vm0, %v1913_v41 }

</bundles_post_ra>
